<compile_context>
chip_gen: v6e
topology: v6e:2x2x1
jax: 0.10.0
libtpu: 0.0.40
codegen_flags: <defaults>
</compile_context>

<pallas_src>
import jax
import jax.numpy as jnp
import numpy as np
from jax.experimental import pallas as pl
from jax.experimental.pallas import tpu as pltpu


def _rup(n, m=128):
    return ((n + m - 1) // m) * m


# ---------------------------------------------------------------------------
# Kernel: grid over decode steps; weights + encoder outputs copied to VMEM once,
# hidden state + projected encoder features carried in VMEM scratch across steps.
# ---------------------------------------------------------------------------
def _decoder_kernel(x_ref, h0_ref, enc_ref, attn_we_ref, w_h_ref, w_x_ref,
                    w_w_ref, fc_wh_ref, bias_ref,
                    pred_ref, hout_ref,
                    eproj_ref, hcarry_ref):
    f32, bf16 = jnp.float32, jnp.bfloat16
    t = pl.program_id(0)

    enc = enc_ref[...]                        # [B, S, Ep] bf16 (resident, DMA'd once)
    B, S, Ep = enc.shape
    Hp = hcarry_ref.shape[1]
    Op = pred_ref.shape[2]

    # Packed biases (f32): rows = attn_b, attn_v, b_r, b_z, b_in, b_hn, fc_b, pad
    attn_b = bias_ref[0:1, :Hp]
    attn_v = bias_ref[1:2, :Hp]
    b_r = bias_ref[2:3, :Hp]
    b_z = bias_ref[3:4, :Hp]
    b_in = bias_ref[4:5, :Hp]
    b_hn = bias_ref[5:6, :Hp]
    fc_b = bias_ref[6:7, :Op]

    # ---- loop-invariant work, done once at step 0 --------------------------
    @pl.when(t == 0)
    def _():
        # Encoder part of the attention energy: flat 2D matmul, stored in scratch.
        e_flat = jnp.dot(enc.reshape(B * S, Ep), attn_we_ref[...],
                         preferred_element_type=f32)               # [B*S, Hp]
        eproj_ref[...] = e_flat.reshape(B, S, Hp) + attn_b          # [B, S, Hp]
        hcarry_ref[...] = h0_ref[...]                               # init carried hidden

    x = x_ref[0]                               # [B, Op] bf16 (this step's input)
    h = hcarry_ref[...]                        # [B, Hp] f32 (carried across steps)
    h_bf = h.astype(bf16)

    # ---- x-path matmul: GRU input gates + fc_out(embedded); off critical path ----
    xc = jnp.dot(x, w_x_ref[...], preferred_element_type=f32)       # [B, 3Hp + Op]
    gi_x = xc[:, :3 * Hp]
    pred_x = xc[:, 3 * Hp:]

    # ---- fused h-path matmul: cols [0:Hp] = attn W_h h, [Hp:4Hp] = GRU gates ----
    hc = jnp.dot(h_bf, w_h_ref[...], preferred_element_type=f32)    # [B, 4Hp]
    h_part = hc[:, :Hp]
    gh = hc[:, Hp:]

    # ---- Bahdanau attention: softmax_s( v . tanh(W_h h + W_e enc + b) ) ----
    energy = jnp.tanh(h_part[:, None, :] + eproj_ref[...])          # [B, S, Hp]
    score = jnp.sum(energy * attn_v, axis=-1)                       # [B, S]
    score = score - jnp.max(score, axis=-1, keepdims=True)
    p = jnp.exp(score)
    attn = p * pl.reciprocal(jnp.sum(p, axis=-1, keepdims=True), approx=True)

    # ---- weighted context on the MXU: sum_s attn[b,s] * enc[b,s,:] ----
    weighted = jnp.einsum('bks,bsf->bkf', attn[:, None, :].astype(bf16), enc,
                          preferred_element_type=f32)[:, 0, :]      # [B, Ep] f32
    weighted_bf = weighted.astype(bf16)

    # ---- weighted-path matmul: GRU input gates + fc_out(weighted) ----
    wc = jnp.dot(weighted_bf, w_w_ref[...], preferred_element_type=f32)  # [B, 3Hp+Op]
    gi = gi_x + wc[:, :3 * Hp]
    pred_wx = pred_x + wc[:, 3 * Hp:]

    # ---- single-step GRU (gate order r | z | n) ----
    r = jax.nn.sigmoid(gi[:, :Hp] + gh[:, :Hp] + b_r)
    z = jax.nn.sigmoid(gi[:, Hp:2 * Hp] + gh[:, Hp:2 * Hp] + b_z)
    n = jnp.tanh(gi[:, 2 * Hp:] + b_in + r * (gh[:, 2 * Hp:] + b_hn))
    h_new = (1.0 - z) * n + z * h                                    # [B, Hp] f32

    hcarry_ref[...] = h_new
    hout_ref[...] = h_new

    # ---- fc_out: only the h_new-dependent part is on the critical path ----
    pred_ref[0] = pred_wx + fc_b + jnp.dot(h_new.astype(bf16), fc_wh_ref[...],
                                           preferred_element_type=f32)


# ---------------------------------------------------------------------------
# One-time parameter packing (hoisted out of the decode loop)
# ---------------------------------------------------------------------------
def pack_decoder_params(params):
    f32, bf16 = jnp.float32, jnp.bfloat16
    attn_W = jnp.asarray(params["attn_W"], f32)   # [H, H + 2E]
    attn_b = jnp.asarray(params["attn_b"], f32)   # [H]
    attn_v = jnp.asarray(params["attn_v"], f32)   # [H]
    W_ih = jnp.asarray(params["W_ih"], f32)       # [3H, O + 2E]
    W_hh = jnp.asarray(params["W_hh"], f32)       # [3H, H]
    b_ih = jnp.asarray(params["b_ih"], f32)       # [3H]
    b_hh = jnp.asarray(params["b_hh"], f32)       # [3H]
    fc_W = jnp.asarray(params["fc_W"], f32)       # [O, H + 2E + O]
    fc_b = jnp.asarray(params["fc_b"], f32)       # [O]

    H = W_hh.shape[1]
    O = fc_W.shape[0]
    twoE = W_ih.shape[1] - O
    Hp, Ep, Op = _rup(H), _rup(twoE), _rup(O)
    Wb = max(Hp, Op)

    def pad2(a, r, c):
        return jnp.pad(a, ((0, r - a.shape[0]), (0, c - a.shape[1])))

    def pad1(a, n):
        return jnp.pad(a, (0, n - a.shape[0]))

    # Attention Linear(H + 2E -> H): split hidden vs encoder-output columns, transposed.
    attn_Wh = pad2(attn_W[:, :H].T, Hp, Hp)           # [Hp, Hp]
    attn_We = pad2(attn_W[:, H:].T, Ep, Hp)           # [Ep, Hp]

    # GRU weights: transposed to [K, 3H], each gate block zero-padded H -> Hp.
    def gate_cols(Wt, rows_out):                      # Wt: [K, 3H] -> [rows_out, 3Hp]
        return jnp.concatenate(
            [pad2(Wt[:, g * H:(g + 1) * H], rows_out, Hp) for g in range(3)], axis=1)

    W_ih_T = W_ih.T                                   # [O + 2E, 3H]
    gru_x = gate_cols(W_ih_T[:O], Op)                 # [Op, 3Hp]  (embedded rows)
    gru_w = gate_cols(W_ih_T[O:], Ep)                 # [Ep, 3Hp]  (weighted rows)
    gru_h = gate_cols(W_hh.T, Hp)                     # [Hp, 3Hp]

    # fc_out Linear(H + 2E + O -> O), transposed; split by input source, cols O -> Op.
    fcT = fc_W.T                                      # [H + 2E + O, O]
    fc_h = pad2(fcT[:H], Hp, Op)                      # rows for h_new
    fc_w = pad2(fcT[H:H + twoE], Ep, Op)              # rows for weighted
    fc_x = pad2(fcT[H + twoE:], Op, Op)               # rows for embedded

    # Fuse matmuls by shared LHS (shortens the serial matmul chain in-kernel).
    W_h = jnp.concatenate([attn_Wh, gru_h], axis=1).astype(bf16)    # [Hp, 4Hp]
    W_x = jnp.concatenate([gru_x, fc_x], axis=1).astype(bf16)       # [Op, 3Hp+Op]
    W_w = jnp.concatenate([gru_w, fc_w], axis=1).astype(bf16)       # [Ep, 3Hp+Op]
    fc_Wh = fc_h.astype(bf16)                                       # [Hp, Op]
    attn_We = attn_We.astype(bf16)                                  # [Ep, Hp]

    # Packed biases (f32); r/z input+hidden biases folded, b_in/b_hn kept separate.
    biases = jnp.stack([
        pad1(attn_b, Wb),
        pad1(attn_v, Wb),
        pad1(b_ih[:H] + b_hh[:H], Wb),               # b_r
        pad1(b_ih[H:2 * H] + b_hh[H:2 * H], Wb),     # b_z
        pad1(b_ih[2 * H:], Wb),                      # b_in
        pad1(b_hh[2 * H:], Wb),                      # b_hn (gated by r)
        pad1(fc_b, Wb),
        jnp.zeros((Wb,), f32),                       # pad row to 8 sublanes
    ])

    return {"attn_We": attn_We, "W_h": W_h, "W_x": W_x, "W_w": W_w,
            "fc_Wh": fc_Wh, "biases": biases,
            "H": H, "O": O, "twoE": twoE, "Hp": Hp, "Ep": Ep, "Op": Op}


def prepare_encoder_outputs(encoder_outputs, packed):
    """[S, B, 2E] -> [B, S, Ep] bf16. Loop-invariant: call once per sequence."""
    enc = jnp.transpose(jnp.asarray(encoder_outputs, jnp.float32), (1, 0, 2))
    enc = jnp.pad(enc, ((0, 0), (0, 0), (0, packed["Ep"] - enc.shape[2])))
    return enc.astype(jnp.bfloat16)


# ---------------------------------------------------------------------------
# Fused multi-step decode: one pallas_call, grid over decode steps.
# ---------------------------------------------------------------------------
def decode(dec_inputs, hidden, enc_prepped, packed):
    """dec_inputs [T, B, O] (one decoder input per step, teacher-forced),
    hidden [B, H], enc_prepped [B, S, Ep] (from prepare_encoder_outputs).
    Returns (predictions [T, B, O] f32, final hidden [B, H] f32)."""
    x = jnp.asarray(dec_inputs, jnp.float32)       # dropout == identity (eval)
    T, B, O = x.shape
    H, Hp, Op = packed["H"], packed["Hp"], packed["Op"]
    S, Ep = enc_prepped.shape[1], enc_prepped.shape[2]

    x_pad = jnp.pad(x, ((0, 0), (0, 0), (0, Op - O))).astype(jnp.bfloat16)
    h_pad = jnp.pad(jnp.asarray(hidden, jnp.float32), ((0, 0), (0, Hp - H)))

    const2 = lambda t: (0, 0)
    const3 = lambda t: (0, 0, 0)
    in_specs = [
        pl.BlockSpec((1, B, Op), lambda t: (t, 0, 0)),          # per-step input
        pl.BlockSpec((B, Hp), const2),                          # h0 (read at t==0)
        pl.BlockSpec((B, S, Ep), const3),                       # encoder outputs (resident)
        pl.BlockSpec(packed["attn_We"].shape, const2),          # weights: DMA'd once
        pl.BlockSpec(packed["W_h"].shape, const2),
        pl.BlockSpec(packed["W_x"].shape, const2),
        pl.BlockSpec(packed["W_w"].shape, const2),
        pl.BlockSpec(packed["fc_Wh"].shape, const2),
        pl.BlockSpec(packed["biases"].shape, const2),
    ]
    out_specs = (pl.BlockSpec((1, B, Op), lambda t: (t, 0, 0)),
                 pl.BlockSpec((B, Hp), const2))

    preds_pad, h_final_pad = pl.pallas_call(
        _decoder_kernel,
        grid=(T,),
        in_specs=in_specs,
        out_specs=out_specs,
        out_shape=(jax.ShapeDtypeStruct((T, B, Op), jnp.float32),
                   jax.ShapeDtypeStruct((B, Hp), jnp.float32)),
        scratch_shapes=[pltpu.VMEM((B, S, Hp), jnp.float32),    # projected encoder feats
                        pltpu.VMEM((B, Hp), jnp.float32)],      # carried hidden state
        compiler_params=pltpu.CompilerParams(
            dimension_semantics=("arbitrary",)),                # sequential: h carries over
    )(x_pad, h_pad, enc_prepped, packed["attn_We"], packed["W_h"],
      packed["W_x"], packed["W_w"], packed["fc_Wh"], packed["biases"])

    return preds_pad[:, :, :O], h_final_pad[:, :H]


def decoder_step(dec_input, hidden, enc_prepped, packed):
    """Single-step forward matching the PyTorch module: dec_input [1, B, O]."""
    preds, h_new = decode(dec_input, hidden, enc_prepped, packed)
    return preds[0], h_new


# ---------------------------------------------------------------------------
# Pure-JAX reference (mirrors the PyTorch forward, eval-mode dropout, f32)
# ---------------------------------------------------------------------------
def decoder_reference(dec_input, hidden, encoder_outputs, params):
    x = dec_input[0]                                   # [B, O]
    enc = jnp.transpose(encoder_outputs, (1, 0, 2))    # [B, S, 2E]
    H = hidden.shape[1]
    S = enc.shape[1]

    h_rep = jnp.broadcast_to(hidden[:, None, :], (hidden.shape[0], S, H))
    energy = jnp.tanh(jnp.concatenate([h_rep, enc], axis=-1) @ params["attn_W"].T
                      + params["attn_b"])
    score = energy @ params["attn_v"]
    attn = jax.nn.softmax(score, axis=1)               # [B, S]
    weighted = jnp.einsum("bs,bsf->bf", attn, enc)     # [B, 2E]

    rnn_in = jnp.concatenate([x, weighted], axis=-1)
    gi = rnn_in @ params["W_ih"].T + params["b_ih"]
    gh = hidden @ params["W_hh"].T + params["b_hh"]
    i_r, i_z, i_n = gi[:, :H], gi[:, H:2 * H], gi[:, 2 * H:]
    h_r, h_z, h_n = gh[:, :H], gh[:, H:2 * H], gh[:, 2 * H:]
    r = jax.nn.sigmoid(i_r + h_r)
    z = jax.nn.sigmoid(i_z + h_z)
    n = jnp.tanh(i_n + r * h_n)
    h_new = (1.0 - z) * n + z * hidden

    pred = jnp.concatenate([h_new, weighted, x], axis=-1) @ params["fc_W"].T + params["fc_b"]
    return pred, h_new


def decode_reference(dec_inputs, hidden, encoder_outputs, params):
    preds = []
    for t in range(dec_inputs.shape[0]):
        p, hidden = decoder_reference(dec_inputs[t:t + 1], hidden, encoder_outputs, params)
        preds.append(p)
    return jnp.stack(preds, axis=0), hidden


if __name__ == "__main__":
    # Small shapes consistent with the module's forward.
    B, S, T = 2, 8, 4    # batch, encoder sequence length, decode steps
    O = 8                # output_dim (== decoder "embedding" dim here)
    E = 16               # enc_hid_dim -> encoder outputs have 2E features
    H = 32               # dec_hid_dim

    key = jax.random.PRNGKey(0)
    keys = jax.random.split(key, 12)
    rnd = lambda k, shape: (0.1 * jax.random.normal(k, shape)).astype(jnp.float32)

    dec_inputs = rnd(keys[0], (T, B, O))      # one decoder input per step (teacher-forced)
    hidden = rnd(keys[1], (B, H))
    encoder_outputs = rnd(keys[2], (S, B, 2 * E))

    params = {
        # attention: Linear(2E + H -> H) then v: Linear(H -> 1, bias=False)
        "attn_W": rnd(keys[3], (H, H + 2 * E)),
        "attn_b": rnd(keys[4], (H,)),
        "attn_v": rnd(keys[5], (H,)),
        # GRU(input = 2E + O, hidden = H), PyTorch parameter layout
        "W_ih": rnd(keys[6], (3 * H, 2 * E + O)),
        "W_hh": rnd(keys[7], (3 * H, H)),
        "b_ih": rnd(keys[8], (3 * H,)),
        "b_hh": rnd(keys[9], (3 * H,)),
        # fc_out: Linear(2E + H + O -> O)
        "fc_W": rnd(keys[10], (O, 2 * E + H + O)),
        "fc_b": rnd(keys[11], (O,)),
    }

    # One-time work (outside the autoregressive decode loop).
    packed = pack_decoder_params(params)
    enc_prepped = prepare_encoder_outputs(encoder_outputs, packed)

    # Fused multi-step decode: one pallas_call, weights/enc DMA'd once, hidden carried in VMEM.
    preds, h_final = decode(dec_inputs, hidden, enc_prepped, packed)
    jax.block_until_ready((preds, h_final))

    # Single-step API matching the module forward exactly (same kernel, T=1).
    pred1, h1 = decoder_step(dec_inputs[0:1], hidden, enc_prepped, packed)
    jax.block_until_ready((pred1, h1))

    # Compare against the f32 reference (kernel uses bf16 weights with f32 accumulation).
    preds_ref, h_ref = decode_reference(dec_inputs, hidden, encoder_outputs, params)
    np.testing.assert_allclose(np.asarray(preds), np.asarray(preds_ref), rtol=2e-2, atol=2e-2)
    np.testing.assert_allclose(np.asarray(h_final), np.asarray(h_ref), rtol=2e-2, atol=2e-2)
    np.testing.assert_allclose(np.asarray(pred1), np.asarray(preds_ref[0]), rtol=2e-2, atol=2e-2)
    np.testing.assert_allclose(np.asarray(h1),
                               np.asarray(decoder_reference(dec_inputs[0:1], hidden,
                                                            encoder_outputs, params)[1]),
                               rtol=2e-2, atol=2e-2)

    print("KERNEL_OK")
</pallas_src>

<mosaic_0001>
module attributes {stable_mosaic.version = 11 : i64} {
  func.func @_decoder_kernel(%arg0: i32, %arg1: memref<1x2x128xbf16, #tpu.memory_space<vmem>>, %arg2: memref<2x128xf32, #tpu.memory_space<vmem>>, %arg3: memref<2x8x128xbf16, #tpu.memory_space<vmem>>, %arg4: memref<128x128xbf16, #tpu.memory_space<vmem>>, %arg5: memref<128x512xbf16, #tpu.memory_space<vmem>>, %arg6: memref<128x512xbf16, #tpu.memory_space<vmem>>, %arg7: memref<128x512xbf16, #tpu.memory_space<vmem>>, %arg8: memref<128x128xbf16, #tpu.memory_space<vmem>>, %arg9: memref<8x128xf32, #tpu.memory_space<vmem>>, %arg10: memref<1x2x128xf32, #tpu.memory_space<vmem>>, %arg11: memref<2x128xf32, #tpu.memory_space<vmem>>, %arg12: memref<2x8x128xf32, #tpu.memory_space<vmem>>, %arg13: memref<2x128xf32, #tpu.memory_space<vmem>>) attributes {dimension_semantics = [#tpu.dimension_semantics<arbitrary>], iteration_bounds = array<i64: 4>, scalar_prefetch = 0 : i64, scratch_operands = 2 : i64, tpu.core_type = #tpu.core_type<tc>, window_params = [{transform_indices = @transform_0, window_bounds = array<i64: 1, 2, 128>}, {pipeline_mode = #tpu.pipeline_mode<synchronous>, transform_indices = @transform_1, window_bounds = array<i64: 2, 128>}, {pipeline_mode = #tpu.pipeline_mode<synchronous>, transform_indices = @transform_2, window_bounds = array<i64: 2, 8, 128>}, {pipeline_mode = #tpu.pipeline_mode<synchronous>, transform_indices = @transform_3, window_bounds = array<i64: 128, 128>}, {pipeline_mode = #tpu.pipeline_mode<synchronous>, transform_indices = @transform_4, window_bounds = array<i64: 128, 512>}, {pipeline_mode = #tpu.pipeline_mode<synchronous>, transform_indices = @transform_5, window_bounds = array<i64: 128, 512>}, {pipeline_mode = #tpu.pipeline_mode<synchronous>, transform_indices = @transform_6, window_bounds = array<i64: 128, 512>}, {pipeline_mode = #tpu.pipeline_mode<synchronous>, transform_indices = @transform_7, window_bounds = array<i64: 128, 128>}, {pipeline_mode = #tpu.pipeline_mode<synchronous>, transform_indices = @transform_8, window_bounds = array<i64: 8, 128>}, {transform_indices = @transform_9, window_bounds = array<i64: 1, 2, 128>}, {pipeline_mode = #tpu.pipeline_mode<synchronous>, transform_indices = @transform_10, window_bounds = array<i64: 2, 128>}]} {
    %c0 = arith.constant 0 : index
    %c0_0 = arith.constant 0 : index
    %c0_1 = arith.constant 0 : index
    %0 = vector.load %arg3[%c0, %c0_0, %c0_1] : memref<2x8x128xbf16, #tpu.memory_space<vmem>>, vector<2x8x128xbf16>
    %c0_2 = arith.constant 0 : index
    %c0_3 = arith.constant 0 : index
    %1 = vector.load %arg9[%c0_2, %c0_3] : memref<8x128xf32, #tpu.memory_space<vmem>>, vector<1x128xf32>
    %c1 = arith.constant 1 : index
    %c0_4 = arith.constant 0 : index
    %2 = vector.load %arg9[%c1, %c0_4] : memref<8x128xf32, #tpu.memory_space<vmem>>, vector<1x128xf32>
    %c2 = arith.constant 2 : index
    %c0_5 = arith.constant 0 : index
    %3 = vector.load %arg9[%c2, %c0_5] : memref<8x128xf32, #tpu.memory_space<vmem>>, vector<1x128xf32>
    %c3 = arith.constant 3 : index
    %c0_6 = arith.constant 0 : index
    %4 = vector.load %arg9[%c3, %c0_6] : memref<8x128xf32, #tpu.memory_space<vmem>>, vector<1x128xf32>
    %c4 = arith.constant 4 : index
    %c0_7 = arith.constant 0 : index
    %5 = vector.load %arg9[%c4, %c0_7] : memref<8x128xf32, #tpu.memory_space<vmem>>, vector<1x128xf32>
    %c5 = arith.constant 5 : index
    %c0_8 = arith.constant 0 : index
    %6 = vector.load %arg9[%c5, %c0_8] : memref<8x128xf32, #tpu.memory_space<vmem>>, vector<1x128xf32>
    %c6 = arith.constant 6 : index
    %c0_9 = arith.constant 0 : index
    %7 = vector.load %arg9[%c6, %c0_9] : memref<8x128xf32, #tpu.memory_space<vmem>>, vector<1x128xf32>
    %c0_i32 = arith.constant 0 : i32
    %8 = arith.cmpi eq, %arg0, %c0_i32 : i32
    %9 = arith.extui %8 : i1 to i32
    %c0_i32_10 = arith.constant 0 : i32
    %10 = arith.cmpi ne, %9, %c0_i32_10 : i32
    scf.if %10 {
      %98 = vector.shape_cast %0 : vector<2x8x128xbf16> to vector<16x128xbf16>
      %c0_44 = arith.constant 0 : index
      %c0_45 = arith.constant 0 : index
      %99 = vector.load %arg4[%c0_44, %c0_45] : memref<128x128xbf16, #tpu.memory_space<vmem>>, vector<128x128xbf16>
      %cst_46 = arith.constant dense<0.000000e+00> : vector<16x128xf32>
      %100 = tpu.matmul %98, %99, %cst_46 {dimension_numbers = #tpu.dot_dimension_numbers<[1], [0], [0], [1], [0, 0, 1, 1], [], []>} : vector<16x128xbf16>, vector<128x128xbf16>, vector<16x128xf32> -> vector<16x128xf32>
      %101 = vector.shape_cast %100 : vector<16x128xf32> to vector<2x8x128xf32>
      %102 = vector.shape_cast %1 : vector<1x128xf32> to vector<1x1x128xf32>
      %103 = vector.broadcast %102 : vector<1x1x128xf32> to vector<2x8x128xf32>
      %104 = arith.addf %101, %103 : vector<2x8x128xf32>
      %c0_47 = arith.constant 0 : index
      %c0_48 = arith.constant 0 : index
      %c0_49 = arith.constant 0 : index
      %105 = vector.load %arg12[%c0_47, %c0_48, %c0_49] : memref<2x8x128xf32, #tpu.memory_space<vmem>>, vector<2x8x128xf32>
      tpu.vector_store %arg12[%c0_47, %c0_48, %c0_49], %104 {strides = array<i32>} : memref<2x8x128xf32, #tpu.memory_space<vmem>>, vector<2x8x128xf32>,
      %c0_50 = arith.constant 0 : index
      %c0_51 = arith.constant 0 : index
      %106 = vector.load %arg2[%c0_50, %c0_51] : memref<2x128xf32, #tpu.memory_space<vmem>>, vector<2x128xf32>
      %c0_52 = arith.constant 0 : index
      %c0_53 = arith.constant 0 : index
      %107 = vector.load %arg13[%c0_52, %c0_53] : memref<2x128xf32, #tpu.memory_space<vmem>>, vector<2x128xf32>
      tpu.vector_store %arg13[%c0_52, %c0_53], %106 {strides = array<i32>} : memref<2x128xf32, #tpu.memory_space<vmem>>, vector<2x128xf32>,
    } else {
    }
    %c0_11 = arith.constant 0 : index
    %c0_12 = arith.constant 0 : index
    %c0_13 = arith.constant 0 : index
    %11 = vector.load %arg1[%c0_11, %c0_12, %c0_13] : memref<1x2x128xbf16, #tpu.memory_space<vmem>>, vector<1x2x128xbf16>
    %12 = vector.shape_cast %11 : vector<1x2x128xbf16> to vector<2x128xbf16>
    %c0_14 = arith.constant 0 : index
    %c0_15 = arith.constant 0 : index
    %13 = vector.load %arg13[%c0_14, %c0_15] : memref<2x128xf32, #tpu.memory_space<vmem>>, vector<2x128xf32>
    %14 = arith.truncf %13 : vector<2x128xf32> to vector<2x128xbf16>
    %c0_16 = arith.constant 0 : index
    %c0_17 = arith.constant 0 : index
    %15 = vector.load %arg6[%c0_16, %c0_17] : memref<128x512xbf16, #tpu.memory_space<vmem>>, vector<128x512xbf16>
    %cst = arith.constant dense<0.000000e+00> : vector<2x512xf32>
    %16 = tpu.matmul %12, %15, %cst {dimension_numbers = #tpu.dot_dimension_numbers<[1], [0], [0], [1], [0, 0, 1, 1], [], []>} : vector<2x128xbf16>, vector<128x512xbf16>, vector<2x512xf32> -> vector<2x512xf32>
    %17 = vector.extract_strided_slice %16 {offsets = [0, 0], sizes = [2, 384], strides = [1, 1]} : vector<2x512xf32> to vector<2x384xf32>
    %18 = vector.extract_strided_slice %16 {offsets = [0, 384], sizes = [2, 128], strides = [1, 1]} : vector<2x512xf32> to vector<2x128xf32>
    %c0_18 = arith.constant 0 : index
    %c0_19 = arith.constant 0 : index
    %19 = vector.load %arg5[%c0_18, %c0_19] : memref<128x512xbf16, #tpu.memory_space<vmem>>, vector<128x512xbf16>
    %cst_20 = arith.constant dense<0.000000e+00> : vector<2x512xf32>
    %20 = tpu.matmul %14, %19, %cst_20 {dimension_numbers = #tpu.dot_dimension_numbers<[1], [0], [0], [1], [0, 0, 1, 1], [], []>} : vector<2x128xbf16>, vector<128x512xbf16>, vector<2x512xf32> -> vector<2x512xf32>
    %21 = vector.extract_strided_slice %20 {offsets = [0, 0], sizes = [2, 128], strides = [1, 1]} : vector<2x512xf32> to vector<2x128xf32>
    %22 = vector.extract_strided_slice %20 {offsets = [0, 128], sizes = [2, 384], strides = [1, 1]} : vector<2x512xf32> to vector<2x384xf32>
    %23 = vector.shape_cast %21 : vector<2x128xf32> to vector<2x1x128xf32>
    %c0_21 = arith.constant 0 : index
    %c0_22 = arith.constant 0 : index
    %c0_23 = arith.constant 0 : index
    %24 = vector.load %arg12[%c0_21, %c0_22, %c0_23] : memref<2x8x128xf32, #tpu.memory_space<vmem>>, vector<2x8x128xf32>
    %25 = vector.broadcast %23 : vector<2x1x128xf32> to vector<2x8x128xf32>
    %26 = arith.addf %25, %24 : vector<2x8x128xf32>
    %27 = math.tanh %26 : vector<2x8x128xf32>
    %28 = vector.shape_cast %2 : vector<1x128xf32> to vector<1x1x128xf32>
    %29 = vector.broadcast %28 : vector<1x1x128xf32> to vector<2x8x128xf32>
    %30 = arith.mulf %27, %29 : vector<2x8x128xf32>
    %cst_24 = arith.constant dense<0.000000e+00> : vector<2x8xf32>
    %31 = vector.multi_reduction <add>, %30, %cst_24 [2] : vector<2x8x128xf32> to vector<2x8xf32>
    %cst_25 = arith.constant dense<0xFF800000> : vector<2xf32>
    %32 = vector.multi_reduction <maximumf>, %31, %cst_25 [1] : vector<2x8xf32> to vector<2xf32>
    %33 = vector.shape_cast %32 : vector<2xf32> to vector<2x1xf32>
    %34 = vector.broadcast %33 : vector<2x1xf32> to vector<2x8xf32>
    %35 = arith.subf %31, %34 : vector<2x8xf32>
    %36 = math.exp %35 : vector<2x8xf32>
    %cst_26 = arith.constant dense<0.000000e+00> : vector<2xf32>
    %37 = vector.multi_reduction <add>, %36, %cst_26 [1] : vector<2x8xf32> to vector<2xf32>
    %38 = vector.shape_cast %37 : vector<2xf32> to vector<2x1xf32>
    %39 = tpu.reciprocal %38 {approx = true} : vector<2x1xf32> -> vector<2x1xf32>
    %40 = vector.broadcast %39 : vector<2x1xf32> to vector<2x8xf32>
    %41 = arith.mulf %36, %40 : vector<2x8xf32>
    %42 = vector.shape_cast %41 : vector<2x8xf32> to vector<2x1x8xf32>
    %43 = arith.truncf %42 : vector<2x1x8xf32> to vector<2x1x8xbf16>
    "tpu.trace_start"() <{level = 10 : i32, message = "bks,bsf->bkf"}> : () -> ()
    %cst_27 = arith.constant dense<0.000000e+00> : vector<2x1x128xf32>
    %44 = tpu.matmul %43, %0, %cst_27 {dimension_numbers = #tpu.dot_dimension_numbers<[2], [1], [1], [2], [0, 0, 0, 1, 1, 2], [0], [0]>} : vector<2x1x8xbf16>, vector<2x8x128xbf16>, vector<2x1x128xf32> -> vector<2x1x128xf32>
    "tpu.trace_stop"() : () -> ()
    %45 = vector.shape_cast %44 : vector<2x1x128xf32> to vector<2x128xf32>
    %46 = arith.truncf %45 : vector<2x128xf32> to vector<2x128xbf16>
    %c0_28 = arith.constant 0 : index
    %c0_29 = arith.constant 0 : index
    %47 = vector.load %arg7[%c0_28, %c0_29] : memref<128x512xbf16, #tpu.memory_space<vmem>>, vector<128x512xbf16>
    %cst_30 = arith.constant dense<0.000000e+00> : vector<2x512xf32>
    %48 = tpu.matmul %46, %47, %cst_30 {dimension_numbers = #tpu.dot_dimension_numbers<[1], [0], [0], [1], [0, 0, 1, 1], [], []>} : vector<2x128xbf16>, vector<128x512xbf16>, vector<2x512xf32> -> vector<2x512xf32>
    %49 = vector.extract_strided_slice %48 {offsets = [0, 0], sizes = [2, 384], strides = [1, 1]} : vector<2x512xf32> to vector<2x384xf32>
    %50 = arith.addf %17, %49 : vector<2x384xf32>
    %51 = vector.extract_strided_slice %48 {offsets = [0, 384], sizes = [2, 128], strides = [1, 1]} : vector<2x512xf32> to vector<2x128xf32>
    %52 = arith.addf %18, %51 : vector<2x128xf32>
    %53 = vector.extract_strided_slice %50 {offsets = [0, 0], sizes = [2, 128], strides = [1, 1]} : vector<2x384xf32> to vector<2x128xf32>
    %54 = vector.extract_strided_slice %22 {offsets = [0, 0], sizes = [2, 128], strides = [1, 1]} : vector<2x384xf32> to vector<2x128xf32>
    %55 = arith.addf %53, %54 : vector<2x128xf32>
    %56 = vector.broadcast %3 : vector<1x128xf32> to vector<2x128xf32>
    %57 = arith.addf %55, %56 : vector<2x128xf32>
    %58 = arith.negf %57 : vector<2x128xf32>
    %59 = math.exp %58 : vector<2x128xf32>
    %cst_31 = arith.constant 1.000000e+00 : f32
    %60 = vector.broadcast %cst_31 : f32 to vector<2x128xf32>
    %61 = arith.addf %60, %59 : vector<2x128xf32>
    %62 = arith.divf %60, %61 : vector<2x128xf32>
    %63 = vector.extract_strided_slice %50 {offsets = [0, 128], sizes = [2, 128], strides = [1, 1]} : vector<2x384xf32> to vector<2x128xf32>
    %64 = vector.extract_strided_slice %22 {offsets = [0, 128], sizes = [2, 128], strides = [1, 1]} : vector<2x384xf32> to vector<2x128xf32>
    %65 = arith.addf %63, %64 : vector<2x128xf32>
    %66 = vector.broadcast %4 : vector<1x128xf32> to vector<2x128xf32>
    %67 = arith.addf %65, %66 : vector<2x128xf32>
    %68 = arith.negf %67 : vector<2x128xf32>
    %69 = math.exp %68 : vector<2x128xf32>
    %cst_32 = arith.constant 1.000000e+00 : f32
    %70 = vector.broadcast %cst_32 : f32 to vector<2x128xf32>
    %71 = arith.addf %70, %69 : vector<2x128xf32>
    %72 = arith.divf %70, %71 : vector<2x128xf32>
    %73 = vector.extract_strided_slice %50 {offsets = [0, 256], sizes = [2, 128], strides = [1, 1]} : vector<2x384xf32> to vector<2x128xf32>
    %74 = vector.broadcast %5 : vector<1x128xf32> to vector<2x128xf32>
    %75 = arith.addf %73, %74 : vector<2x128xf32>
    %76 = vector.extract_strided_slice %22 {offsets = [0, 256], sizes = [2, 128], strides = [1, 1]} : vector<2x384xf32> to vector<2x128xf32>
    %77 = vector.broadcast %6 : vector<1x128xf32> to vector<2x128xf32>
    %78 = arith.addf %76, %77 : vector<2x128xf32>
    %79 = arith.mulf %62, %78 : vector<2x128xf32>
    %80 = arith.addf %75, %79 : vector<2x128xf32>
    %81 = math.tanh %80 : vector<2x128xf32>
    %cst_33 = arith.constant 1.000000e+00 : f32
    %82 = vector.broadcast %cst_33 : f32 to vector<2x128xf32>
    %83 = arith.subf %82, %72 : vector<2x128xf32>
    %84 = arith.mulf %83, %81 : vector<2x128xf32>
    %85 = arith.mulf %72, %13 : vector<2x128xf32>
    %86 = arith.addf %84, %85 : vector<2x128xf32>
    %c0_34 = arith.constant 0 : index
    %c0_35 = arith.constant 0 : index
    %87 = vector.load %arg13[%c0_34, %c0_35] : memref<2x128xf32, #tpu.memory_space<vmem>>, vector<2x128xf32>
    tpu.vector_store %arg13[%c0_34, %c0_35], %86 {strides = array<i32>} : memref<2x128xf32, #tpu.memory_space<vmem>>, vector<2x128xf32>,
    %c0_36 = arith.constant 0 : index
    %c0_37 = arith.constant 0 : index
    %88 = vector.load %arg11[%c0_36, %c0_37] : memref<2x128xf32, #tpu.memory_space<vmem>>, vector<2x128xf32>
    tpu.vector_store %arg11[%c0_36, %c0_37], %86 {strides = array<i32>} : memref<2x128xf32, #tpu.memory_space<vmem>>, vector<2x128xf32>,
    %89 = vector.broadcast %7 : vector<1x128xf32> to vector<2x128xf32>
    %90 = arith.addf %52, %89 : vector<2x128xf32>
    %91 = arith.truncf %86 : vector<2x128xf32> to vector<2x128xbf16>
    %c0_38 = arith.constant 0 : index
    %c0_39 = arith.constant 0 : index
    %92 = vector.load %arg8[%c0_38, %c0_39] : memref<128x128xbf16, #tpu.memory_space<vmem>>, vector<128x128xbf16>
    %cst_40 = arith.constant dense<0.000000e+00> : vector<2x128xf32>
    %93 = tpu.matmul %91, %92, %cst_40 {dimension_numbers = #tpu.dot_dimension_numbers<[1], [0], [0], [1], [0, 0, 1, 1], [], []>} : vector<2x128xbf16>, vector<128x128xbf16>, vector<2x128xf32> -> vector<2x128xf32>
    %94 = arith.addf %90, %93 : vector<2x128xf32>
    %c0_41 = arith.constant 0 : index
    %c0_42 = arith.constant 0 : index
    %c0_43 = arith.constant 0 : index
    %95 = vector.load %arg10[%c0_41, %c0_42, %c0_43] : memref<1x2x128xf32, #tpu.memory_space<vmem>>, vector<1x2x128xf32>
    %96 = vector.shape_cast %95 : vector<1x2x128xf32> to vector<2x128xf32>
    %97 = vector.shape_cast %94 : vector<2x128xf32> to vector<1x2x128xf32>
    tpu.vector_store %arg10[%c0_41, %c0_42, %c0_43], %97 {strides = array<i32>} : memref<1x2x128xf32, #tpu.memory_space<vmem>>, vector<1x2x128xf32>,
    return
  }
  func.func @transform_0(%arg0: i32) -> (i32, i32, i32) {
    %c0_i32 = arith.constant 0 : i32
    %c0_i32_0 = arith.constant 0 : i32
    %c0_i32_1 = arith.constant 0 : i32
    return %arg0, %c0_i32, %c0_i32_0 : i32, i32, i32
  }
  func.func @transform_1(%arg0: i32) -> (i32, i32) {
    %c0_i32 = arith.constant 0 : i32
    %c0_i32_0 = arith.constant 0 : i32
    %c0_i32_1 = arith.constant 0 : i32
    return %c0_i32, %c0_i32_0 : i32, i32
  }
  func.func @transform_2(%arg0: i32) -> (i32, i32, i32) {
    %c0_i32 = arith.constant 0 : i32
    %c0_i32_0 = arith.constant 0 : i32
    %c0_i32_1 = arith.constant 0 : i32
    %c0_i32_2 = arith.constant 0 : i32
    return %c0_i32, %c0_i32_0, %c0_i32_1 : i32, i32, i32
  }
  func.func @transform_3(%arg0: i32) -> (i32, i32) {
    %c0_i32 = arith.constant 0 : i32
    %c0_i32_0 = arith.constant 0 : i32
    %c0_i32_1 = arith.constant 0 : i32
    return %c0_i32, %c0_i32_0 : i32, i32
  }
  func.func @transform_4(%arg0: i32) -> (i32, i32) {
    %c0_i32 = arith.constant 0 : i32
    %c0_i32_0 = arith.constant 0 : i32
    %c0_i32_1 = arith.constant 0 : i32
    return %c0_i32, %c0_i32_0 : i32, i32
  }
  func.func @transform_5(%arg0: i32) -> (i32, i32) {
    %c0_i32 = arith.constant 0 : i32
    %c0_i32_0 = arith.constant 0 : i32
    %c0_i32_1 = arith.constant 0 : i32
    return %c0_i32, %c0_i32_0 : i32, i32
  }
  func.func @transform_6(%arg0: i32) -> (i32, i32) {
    %c0_i32 = arith.constant 0 : i32
    %c0_i32_0 = arith.constant 0 : i32
    %c0_i32_1 = arith.constant 0 : i32
    return %c0_i32, %c0_i32_0 : i32, i32
  }
  func.func @transform_7(%arg0: i32) -> (i32, i32) {
    %c0_i32 = arith.constant 0 : i32
    %c0_i32_0 = arith.constant 0 : i32
    %c0_i32_1 = arith.constant 0 : i32
    return %c0_i32, %c0_i32_0 : i32, i32
  }
  func.func @transform_8(%arg0: i32) -> (i32, i32) {
    %c0_i32 = arith.constant 0 : i32
    %c0_i32_0 = arith.constant 0 : i32
    %c0_i32_1 = arith.constant 0 : i32
    return %c0_i32, %c0_i32_0 : i32, i32
  }
  func.func @transform_9(%arg0: i32) -> (i32, i32, i32) {
    %c0_i32 = arith.constant 0 : i32
    %c0_i32_0 = arith.constant 0 : i32
    %c0_i32_1 = arith.constant 0 : i32
    return %arg0, %c0_i32, %c0_i32_0 : i32, i32, i32
  }
  func.func @transform_10(%arg0: i32) -> (i32, i32) {
    %c0_i32 = arith.constant 0 : i32
    %c0_i32_0 = arith.constant 0 : i32
    %c0_i32_1 = arith.constant 0 : i32
    return %c0_i32, %c0_i32_0 : i32, i32
  }
}

</mosaic_0001>

<bundles_post_ra>
// kernel: tpu_custom_call.1
= control target key start
LH: loop header
LB: loop body
LE: loop exit
PB: predicated region body
PF: predicated region fallthrough
CT: control target
= control target key end

     0   :  { %s3350_s0 = inlined_call_operand.hbm [shape: bf16[4,2,128], index: 0, kind: input, shape index: {}]   ;;  %s3351_s1 = inlined_call_operand.hbm [shape: f32[2,128], index: 1, kind: input, shape index: {}]   ;;  %s3352_s2 = inlined_call_operand.hbm [shape: bf16[2,8,128], index: 2, kind: input, shape index: {}]   ;;  %s3353_s3 = inlined_call_operand.hbm [shape: bf16[128,128], index: 3, kind: input, shape index: {}]   ;;  %s3354_s4 = inlined_call_operand.hbm [shape: bf16[128,512], index: 4, kind: input, shape index: {}]   ;;  %s3355_s5 = inlined_call_operand.hbm [shape: bf16[128,512], index: 5, kind: input, shape index: {}]   ;;  %s3356_s6 = inlined_call_operand.hbm [shape: bf16[128,512], index: 6, kind: input, shape index: {}]   ;;  %s3357_s7 = inlined_call_operand.hbm [shape: bf16[128,128], index: 7, kind: input, shape index: {}]   ;;  %s3358_s8 = inlined_call_operand.vmem [shape: f32[8,128], index: 8, kind: input, shape index: {}]   ;;  %s3359_s9 = inlined_call_operand.hbm [shape: f32[4,2,128], index: 9, kind: output, shape index: {0}]   ;;  %s3360_s10 = inlined_call_operand.hbm [shape: f32[2,128], index: 10, kind: output, shape index: {1}]  }
   0x1   :  { %3367 = sst [smem:[#allocation28_spill]] %s3351_s1 }
   0x2   :  { %3368 = sst [smem:[#allocation29_spill]] %s3352_s2 }
   0x3   :  { %3369 = sst [smem:[#allocation30_spill]] %s3353_s3 }
   0x4   :  { %3370 = sst [smem:[#allocation31_spill]] %s3354_s4 }
   0x5   :  { %3371 = sst [smem:[#allocation32_spill]] %s3355_s5 }
   0x6   :  { %16 = vsyncpa [#allocation5], 0 }
   0x7   :  { %18 = vsyncpa [#allocation5 + $0x1], 0 }
   0x8   :  { %19 = vsyncpa [#allocation8], 0 }
   0x9   :  { %20 = vsyncpa [#allocation11], 0 }
   0xa   :  { %21 = vsyncpa [#allocation14], 0 }
   0xb   :  { %22 = vsyncpa [#allocation17], 0 }
   0xc   :  { %23 = vsyncpa [#allocation6], 0 }
   0xd   :  { %25 = vsyncpa [#allocation6 + $0x1], 0 }
   0xe   :  { %26 = vsyncpa [#allocation20], 0  ;;  %s2942_s13 = smov 0   ;;  %s2944_s14 = smov 0  }
   0xf   :  { %s2946_s15 = smov 0   ;;  %s2948_s16 = smov 0  }
  0x10 LB: > { %s2867_s17 = smov [#allocation7]   ;;  %s2963_s19 = sadd.s32 4294967295, %s2865_s16   ;;  %s2865_s16 = sphi %s2948_s16, %s3406_s16   ;;  %s2861_s15 = sphi %s2946_s15, %s3405_s15   ;;  %s2857_s14 = sphi %s2944_s14, %s3404_s14   ;;  %s2853_s13 = sphi %s2942_s13, %s3403_s13  }
  0x11   : > { %s291_s18 = sshll.u32 %s2867_s17, 4  ;;  %p2007_p0 = scmp.ge.s32.totalorder %s2865_s16, 1  ;;  %s292_s18 = int_to_ptr.vmem [resolvable:$true] %s291_s18 }
  0x12   : > { %p3361_p1 = scmp.eq.s32.totalorder %s2963_s19, 0  ;;  %p278_p2 = scmp.lt.s32.totalorder %s2865_s16, 5 }
  0x13   : > { %s2868_s21 = smov [#allocation10]   ;;  %s2869_s24 = smov [#allocation13]  }
  0x14   : > { %p2969_p4 = pnand %p2007_p0, %p278_p2  ;;  %s314_s22 = sshll.u32 %s2868_s21, 4  ;;  %s315_s22 = int_to_ptr.vmem [resolvable:$true] %s314_s22 }
  0x15   : > { %s340_s25 = sshll.u32 %s2869_s24, 4  ;;  %s2558_s27 = scalar_lea.vmem %s292_s18, 32  ;;  %s341_s25 = int_to_ptr.vmem [resolvable:$true] %s340_s25 }
  0x16   : > { %s3372_s20 = scalar_select %p2969_p4, 1, 0 }
  0x17   : > { %p2267_p5 = pneg %p2969_p4  ;;  %p2559_p8 = scmp.ne.s32.totalorder %s292_s18, %s2558_s27 }
  0x18   : > { %p2566_p11 = scmp.lt.s32.totalorder %s292_s18, %s292_s18  ;;  %p2567_p12 = scmp.lt.s32.totalorder %s2558_s27, %s2558_s27 }
  0x19   : > { %p2977_p6 = pnand %p2267_p5, %p3361_p1 }
  0x1a   : > { %p2568_p13 = por %p2567_p12, %p2566_p11 }
  0x1b   : > { %p2983_p7 = pneg %p2977_p6 }
  0x1d   : > { %p2561_p9 = pnand %p2559_p8, %p2983_p7 }
  0x1f   : > { %p2562_p10 = pneg %p2561_p9 }
  0x21   : > { %p2569_p0 = pnand %p2568_p13, %p2562_p10 }
  0x23   : > { %2572 = shalt.err (!%p2569_p0)
}
  0x24   : > { %s3375_s1 = sld [smem:[#allocation28_spill]]  ;;  %s2584_s30 = scalar_lea.vmem %s315_s22, 1024 }
  0x25   : > { %p2585_p2 = scmp.ne.s32.totalorder %s315_s22, %s2584_s30  ;;  %p2592_p1 = scmp.lt.s32.totalorder %s315_s22, %s315_s22 }
  0x26   : > { %p2593_p8 = scmp.lt.s32.totalorder %s2584_s30, %s2584_s30 }
  0x27   : > { %p2587_p5 = pnand %p2585_p2, %p2983_p7 }
  0x28   : > { %p2594_p9 = por %p2593_p8, %p2592_p1 }
  0x29   : > { %p2588_p3 = pneg %p2587_p5 }
  0x2a   : > { %2270 = dma.hbm_to_vmem [thread:$0]  (!%p2977_p6), %s3375_s1, 32, %s292_s18, [#allocation8]  }
  0x2b   : > { %p2595_p4 = pnand %p2594_p9, %p2588_p3 }
  0x2d   : > { %2598 = shalt.err (!%p2595_p4)
}
  0x2e   : > { %s3363_s11 = smov 64   ;;  %s2871_s12 = smov 4  }
  0x2f   : > { %s3376_s3 = sld [smem:[#allocation30_spill]]  ;;  %s2610_s21 = scalar_lea.vmem %s341_s25, 4096 }
  0x30   : > { %p2611_p10 = scmp.ne.s32.totalorder %s341_s25, %s2610_s21  ;;  %p2618_p3 = scmp.lt.s32.totalorder %s341_s25, %s341_s25 }
  0x31   : > { %p2619_p4 = scmp.lt.s32.totalorder %s2610_s21, %s2610_s21 }
  0x32   : > { %p2613_p11 = pnand %p2611_p10, %p2983_p7 }
  0x33   : > { %p2620_p12 = por %p2619_p4, %p2618_p3 }
  0x34   : > { %p2614_p1 = pneg %p2613_p11 }
  0x35   : > { %2276 = dma.hbm_to_vmem [thread:$0]  (!%p2977_p6), %s3376_s3, 1024, %s315_s22, [#allocation11], %s3363_s11, %s3363_s11, %s2871_s12  }
  0x36   : > { %p2621_p13 = pnand %p2620_p12, %p2614_p1 }
  0x38   : > { %2624 = shalt.err (!%p2621_p13)
}
  0x39   : > { %s2872_s24 = smov 256   ;;  %s2873_s27 = smov 16  }
  0x3a   : > { %s3377_s5 = sld [smem:[#allocation32_spill]]  ;;  %s2874_s29 = smov [#allocation9]  }
  0x3b   : > { %s301_s30 = sshll.u32 %s2874_s29, 4  ;;  %s2875_s17 = smov [#allocation12]   ;;  %s302_s30 = int_to_ptr.vmem [resolvable:$true] %s301_s30 }
  0x3c   : > { %s327_s18 = sshll.u32 %s2875_s17, 4  ;;  %s2636_s21 = scalar_lea.vmem %s302_s30, 128  ;;  %s328_s18 = int_to_ptr.vmem [resolvable:$true] %s327_s18 }
  0x3d   : > { %p2637_p0 = scmp.ne.s32.totalorder %s302_s30, %s2636_s21  ;;  %p2644_p8 = scmp.lt.s32.totalorder %s302_s30, %s302_s30 }
  0x3e   : > { %p2645_p9 = scmp.lt.s32.totalorder %s2636_s21, %s2636_s21 }
  0x3f   : > { %p2639_p2 = pnand %p2637_p0, %p2983_p7 }
  0x40   : > { %2282 = dma.hbm_to_vmem [thread:$0]  (!%p2977_p6), %s3377_s5, 4096, %s341_s25, [#allocation14], %s2872_s24, %s2872_s24, %s2873_s27  }
  0x41   : > { %p2640_p5 = pneg %p2639_p2  ;;  %p2646_p10 = por %p2645_p9, %p2644_p8 }
  0x43   : > { %p2647_p11 = pnand %p2646_p10, %p2640_p5 }
  0x45   : > { %2650 = shalt.err (!%p2647_p11)
}
  0x46   : > { %s3378_s2 = sld [smem:[#allocation29_spill]]  ;;  %s2662_s28 = scalar_lea.vmem %s328_s18, 4096 }
  0x47   : > { %p2663_p1 = scmp.ne.s32.totalorder %s328_s18, %s2662_s28  ;;  %p2670_p12 = scmp.lt.s32.totalorder %s328_s18, %s328_s18 }
  0x48   : > { %p2671_p13 = scmp.lt.s32.totalorder %s2662_s28, %s2662_s28 }
  0x49   : > { %p2665_p3 = pnand %p2663_p1, %p2983_p7 }
  0x4a   : > { %p2672_p0 = por %p2671_p13, %p2670_p12 }
  0x4b   : > { %p2666_p4 = pneg %p2665_p3 }
  0x4c   : > { %2273 = dma.hbm_to_vmem [thread:$0]  (!%p2977_p6), %s3378_s2, 128, %s302_s30, [#allocation8], %s3363_s11, %s3363_s11, %s2871_s12  }
  0x4d   : > { %p2673_p2 = pnand %p2672_p0, %p2666_p4 }
  0x4f   : > { %2676 = shalt.err (!%p2673_p2)
}
  0x50   : > { %s3379_s4 = sld [smem:[#allocation31_spill]]  ;;  %s2876_s30 = smov [#allocation15]  }
  0x51   : > { %s353_s21 = sshll.u32 %s2876_s30, 4  ;;  %s2877_s25 = smov [#allocation16]   ;;  %s354_s21 = int_to_ptr.vmem [resolvable:$true] %s353_s21 }
  0x52   : > { %s366_s22 = sshll.u32 %s2877_s25, 4  ;;  %s2688_s11 = scalar_lea.vmem %s354_s21, 4096  ;;  %s367_s22 = int_to_ptr.vmem [resolvable:$true] %s366_s22 }
  0x53   : > { %p2689_p5 = scmp.ne.s32.totalorder %s354_s21, %s2688_s11  ;;  %p2696_p10 = scmp.lt.s32.totalorder %s354_s21, %s354_s21 }
  0x54   : > { %p2697_p11 = scmp.lt.s32.totalorder %s2688_s11, %s2688_s11 }
  0x55   : > { %p2691_p8 = pnand %p2689_p5, %p2983_p7 }
  0x56   : > { %2279 = dma.hbm_to_vmem [thread:$0]  (!%p2977_p6), %s3379_s4, 4096, %s328_s18, [#allocation11], %s2872_s24, %s2872_s24, %s2873_s27  }
  0x57   : > { %p2692_p9 = pneg %p2691_p8  ;;  %p2698_p1 = por %p2697_p11, %p2696_p10 }
  0x59   : > { %p2699_p3 = pnand %p2698_p1, %p2692_p9 }
  0x5b   : > { %2702 = shalt.err (!%p2699_p3)
}
  0x5c   : > { %2285 = dma.hbm_to_vmem [thread:$0]  (!%p2977_p6), %s3356_s6, 4096, %s354_s21, [#allocation14], %s2872_s24, %s2872_s24, %s2873_s27  }
  0x5d   : > { %s2714_s29 = scalar_lea.vmem %s367_s22, 1024  ;;  %p2722_p0 = scmp.lt.s32.totalorder %s367_s22, %s367_s22 }
  0x5e   : > { %p2715_p4 = scmp.ne.s32.totalorder %s367_s22, %s2714_s29  ;;  %p2723_p2 = scmp.lt.s32.totalorder %s2714_s29, %s2714_s29 }
  0x60   : > { %p2717_p12 = pnand %p2715_p4, %p2983_p7  ;;  %p2724_p5 = por %p2723_p2, %p2722_p0 }
  0x62   : > { %p2718_p13 = pneg %p2717_p12 }
  0x64   : > { %p2725_p8 = pnand %p2724_p5, %p2718_p13 }
  0x66   : > { %2728 = shalt.err (!%p2725_p8)
}
  0x67   : > { %s3380_s11 = smov 64   ;;  %s2006_s23 = sadd.s32 4294967294, %s2865_s16  }
  0x68   : > { %2288 = dma.hbm_to_vmem [thread:$0]  (!%p2977_p6), %s3357_s7, 1024, %s367_s22, [#allocation17], %s3380_s11, %s3380_s11, %s2871_s12  }
  0x69   : > { %s3056_s26 = sadd.s32 1, %s2865_s16   ;;  %s39_s24 = sadd.s32 1, %s2861_s15 }
  0x6a   : > { %s36_s27 = ssub.s32 %s2865_s16, %s3056_s26  ;;  %p46_p7 = scmp.ne.s32.totalorder %s2861_s15, %s2857_s14 }
  0x6b   : > { %p37_p9 = scmp.eq.s32.totalorder %s36_s27, 0  ;;  %p47_p10 = scmp.eq.s32.totalorder %s2865_s16, 0 }
  0x6c   : > { %p52_p11 = scmp.ne.s32.totalorder %s2857_s14, %s2853_s13  ;;  %p3364_p1 = scmp.eq.s32.totalorder %s2963_s19, 3 }
  0x6d   : > { %s3068_s21 = scalar_select %p37_p9, %s2861_s15, %s39_s24  }
  0x6e   : > { %p48_p3 = por %p47_p10, %p46_p7  ;;  %p3381_p4 = scmp.eq.s32.totalorder %s2963_s19, 0 }
  0x6f   : > { %p3078_p6 = por %p3364_p1, %p46_p7  ;;  %p250_p13 = scmp.eq.s32.totalorder %s2006_s23, 3 }
  0x70   : > { %p3072_p12 = por %p3381_p4, %p52_p11  ;;  %p2304_p0 = scmp.lt.s32.totalorder %s2865_s16, 4 }
  0x71   : > { %s3383_s12 = scalar_select %p3078_p6, 1, 0 }
  0x72   : > { %s3382_s25 = scalar_select %p3072_p12, 1, 0 }
  0x73   : > { %s383_s22 = sand.u32 1, %s2861_s15   ;;  %p3084_p2 = por %p250_p13, %p52_p11 }
  0x74   : > { %s2016_s28 = sshll.u32 %s2865_s16, 4  ;;  %s386_s30 = scalar_lea.vmem [#allocation4], %s383_s22 }
  0x75   : > { %s3384_s18 = scalar_select %p3084_p2, 1, 0 }
  0x76   : > { %s3092_s17 = scalar_lea.hbm %s3350_s0, %s2016_s28  ;;  %s393_s24 = sshll.u32 %s386_s30, 4  ;;  %s394_s24 = int_to_ptr.vmem [resolvable:$true] %s393_s24 }
  0x77   : > { %p3094_p5 = pnand %p2304_p0, %p48_p3  ;;  %s384_s27 = scalar_lea.sflag [#allocation5], %s383_s22 }
  0x78   : > { %s2729_s1 = scalar_lea.hbm %s3092_s17, 16  ;;  %s2734_s11 = scalar_lea.hbm %s3350_s0, 64 }
  0x79   : > { %p2730_p8 = scmp.ne.s32.totalorder %s3092_s17, %s2729_s1  ;;  %p2731_p7 = pneg %p3094_p5 }
  0x7a   : > { %p2735_p11 = scmp.lt.s32.totalorder %s3092_s17, %s3350_s0  ;;  %p2736_p3 = scmp.lt.s32.totalorder %s2734_s11, %s2729_s1 }
  0x7b   : > { %p2732_p9 = pnand %p2731_p7, %p2730_p8 }
  0x7c   : > { %p2737_p4 = por %p2736_p3, %p2735_p11 }
  0x7d   : > { %p2733_p10 = pneg %p2732_p9 }
  0x7f   : > { %p2738_p13 = pnand %p2737_p4, %p2733_p10 }
  0x81   : > { %2741 = shalt.err (!%p2738_p13)
}
  0x82   : > { %s2742_s30 = scalar_lea.vmem %s394_s24, 16  ;;  %s2878_s22 = smov [#allocation4]  }
  0x83   : > { %p2743_p0 = scmp.ne.s32.totalorder %s394_s24, %s2742_s30  ;;  %s2747_s4 = sshll.u32 %s2878_s22, 4  ;;  %s2748_s4 = int_to_ptr.vmem [resolvable:$false] %s2747_s4 }
  0x84   : > { %s2749_s5 = scalar_lea.vmem %s2748_s4, 32  ;;  %p2750_p8 = scmp.lt.s32.totalorder %s394_s24, %s2748_s4 }
  0x85   : > { %p2745_p1 = pnand %p2743_p0, %p2731_p7  ;;  %p2751_p9 = scmp.lt.s32.totalorder %s2749_s5, %s2742_s30 }
  0x87   : > { %p2746_p2 = pneg %p2745_p1  ;;  %p2752_p6 = por %p2751_p9, %p2750_p8 }
  0x89   : > { %p2753_p12 = pnand %p2752_p6, %p2746_p2 }
  0x8b   : > { %2756 = shalt.err (!%p2753_p12)
}
  0x8c   : > { %2292 = dma.hbm_to_vmem [thread:$0]  (!%p3094_p5), %s3092_s17, 16, %s394_s24, %s384_s27  }
  0x8d   : > { %p3386_p10 = scmp.ne.s32.totalorder %s3372_s20, 0 }
  0x8e   : > { %s3115_s1 = sand.u32 (!%p3386_p10), 1, %s2857_s14   ;;  %p3387_p1 = scmp.ne.s32.totalorder (!%p3386_p10), %s3382_s25, 0 }
  0x8f   : > { %402 = sbr.rel (%p3386_p10) target bundleno = 2086 (0x826), region = 56  ;;  %s405_s2 = scalar_lea.sflag (!%p3386_p10), [#allocation5], %s3115_s1 }
  0x90   : > { %s407_s3 = scalar_lea.vmem (!%p3386_p10), [#allocation4], %s3115_s1 }
  0x94   : > { %2824 = dma.done.wait (%p3387_p1), %s405_s2, 16  }
  0x95   : > { %2826 = vsyncadd (%p3387_p1), %s405_s2, 4294967280  ;;  %p3388_p12 = scmp.eq.s32.totalorder %s2963_s19, 0 }
  0x97   : > { %2828 = dma.done.wait (%p3388_p12), [#allocation8], 160   ;;  %p3389_p6 = pmov %p3388_p12 }
  0x99   : > { %2830 = vsyncadd (%p3389_p6), [#allocation8], 4294967136  ;;  %p3390_p2 = pmov %p3389_p6 }
  0x9b   : > { %2832 = dma.done.wait (%p3390_p2), [#allocation11], 5120   ;;  %p3391_p5 = pmov %p3390_p2 }
  0x9c   : > { %p3392_p7 = pmov %p3390_p2 }
  0x9d   : > { %2834 = vsyncadd (%p3391_p5), [#allocation11], 4294962176 }
  0x9e   : > { %2836 = dma.done.wait (%p3392_p7), [#allocation14], 8192   ;;  %p3393_p11 = pmov %p3390_p2 }
  0x9f   : > { %p3394_p3 = pmov %p3390_p2 }
  0xa0   : > { %2838 = vsyncadd (%p3393_p11), [#allocation14], 4294959104 }
  0xa1   : > { %2840 = dma.done.wait (%p3394_p3), [#allocation17], 1024   ;;  %p3395_p4 = pmov %p3390_p2 }
  0xa2   : > { %s2025_s4 = sshll.u32 %s3115_s1, 1  ;;  %v3140_v0 = vld [vmem:[#allocation9] sm:$0xf]  ;;  %v3142_v1 = vld [vmem:[#allocation9 + $0x4] sm:$0xf]  ;;  %p3396_p13 = scmp.ne.s32.totalorder %s2963_s19, 0 }
  0xa3   : > { %2842 = vsyncadd (%p3395_p4), [#allocation17], 4294966272  ;;  %v2036_v2 = vld [vmem:[%s3358_s8] ss:$0 sm:$0xff]  ;;  %v3150_v3 = vld [vmem:[%s3358_s8 + $0x1] ss:$0 sm:$0xff] }
  0xa4   : > { %v3155_v4 = vld [vmem:[%s3358_s8 + $0x2] ss:$0 sm:$0xff]  ;;  %v3160_v5 = vld [vmem:[%s3358_s8 + $0x3] ss:$0 sm:$0xff]  ;;  %v3165_v6 = vld [vmem:[%s3358_s8 + $0x4] ss:$0 sm:$0xff] }
  0xa5   : > { %v3170_v7 = vld [vmem:[%s3358_s8 + $0x5] ss:$0 sm:$0xff]  ;;  %v3175_v8 = vld [vmem:[%s3358_s8 + $0x6] ss:$0 sm:$0xff]  ;;  %s3177_s20 = scalar_lea.vmem [#allocation18], %s2025_s4  ;;  %484 = sbr.rel (%p3396_p13) target bundleno = 403 (0x193), region = 92 }
  0xaa   : > { %v2365_v9 = vld [vmem:[#allocation10 + $0x38] sm:$0xff]   ;;  %v2879_v10 = vmov 0.0   ;;  %v2366_v11 = vld [vmem:[#allocation10 + $0x30] sm:$0xff]   ;;  %vm2880_vm0 = vmmov 0   ;;  %v2367_v12 = vld [vmem:[#allocation10 + $0x28] sm:$0xff]   ;;  %v2027_v18 = vcombine.low %v3140_v0, %v3142_v1 }
  0xab   : > { %2179 = vmatprep.subr.bf16.mxu0 %v2879_v10  ;;  %2195 = vmatprep.mubr.msk.bf16.mxu0 %vm2880_vm0, %v2879_v10  ;;  %v2368_v13 = vld [vmem:[#allocation10 + $0x20] sm:$0xff]   ;;  %v2369_v14 = vld [vmem:[#allocation10 + $0x18] sm:$0xff]   ;;  %v2370_v15 = vld [vmem:[#allocation10 + $0x10] sm:$0xff]  }
  0xac   : > { %2180 = vmatpush3.bf16.msra.mxu0 %v2365_v9  ;;  %v2371_v16 = vld [vmem:[#allocation10 + $0x8] sm:$0xff]   ;;  %v2372_v17 = vld [vmem:[#allocation10] sm:$0xff]   ;;  %v604_v19 = vld [vmem:[#allocation7] sm:$0x3] }
  0xad   : > { %2181 = vmatprep.subr.bf16.mxu0 %v2879_v10  ;;  %605 = vst [vmem:[#allocation3] sm:$0x3] %v604_v19 }
  0xb0   : > { %2182 = vmatpush3.bf16.msra.mxu0 %v2366_v11 }
  0xb1   : > { %2183 = vmatprep.subr.bf16.mxu0 %v2879_v10 }
  0xb4   : > { %2184 = vmatpush3.bf16.msra.mxu0 %v2367_v12 }
  0xb5   : > { %2185 = vmatprep.subr.bf16.mxu0 %v2879_v10 }
  0xb8   : > { %2186 = vmatpush3.bf16.msra.mxu0 %v2368_v13 }
  0xb9   : > { %2187 = vmatprep.subr.bf16.mxu0 %v2879_v10 }
  0xbc   : > { %2188 = vmatpush3.bf16.msra.mxu0 %v2369_v14 }
  0xbd   : > { %2189 = vmatprep.subr.bf16.mxu0 %v2879_v10 }
  0xc0   : > { %2190 = vmatpush3.bf16.msra.mxu0 %v2370_v15 }
  0xc1   : > { %2191 = vmatprep.subr.bf16.mxu0 %v2879_v10 }
  0xc4   : > { %2192 = vmatpush3.bf16.msra.mxu0 %v2371_v16 }
  0xc5   : > { %2193 = vmatprep.subr.bf16.mxu0 %v2879_v10 }
  0xc8   : > { %2194 = vmatpush3.bf16.msra.mxu0 %v2372_v17 }
  0xcb   : > { %2196 = vmatmul.mubr.bf16.vlgmr.msra.gmra.mxu0 %v2027_v18 }
 0x18b   : > { %v589_v20 = vpop.f32.mrf.mxu0 }
 0x18c   : > { %v600_v21 = vadd.f32 %v2036_v2, %v589_v20 }
 0x18d   : > { %v2197_v22 = vpop.f32.mrf.mxu0 }
 0x18e   : > { %602 = vst [vmem:[#allocation2] sm:$0xff] %v600_v21 }
 0x18f   : > { %v592_v23 = vpop.f32.mrf.mxu0 }
 0x190   : > { %v601_v24 = vadd.f32 %v2036_v2, %v592_v23 }
 0x191   : > { %v2198_v25 = vpop.f32.mrf.mxu0 }
 0x192   : > { %603 = vst [vmem:[#allocation2 + $0x8] sm:$0xff] %v601_v24 }
 0x193 PF: > { %v2375_v26 = vld [vmem:[#allocation13 + $0xe4] ss:$16 sps:$4 sm:$0xff]   ;;  %v2377_v27 = vld [vmem:[#allocation13 + $0xe0] ss:$16 sps:$4 sm:$0xff]   ;;  %v2881_v28 = vmov 0   ;;  %v1161_v12 = vlaneseq  ;;  %vm1218_vm1 = vcmask 1041409  }
 0x194   : > { %833 = vmatprep.mubr.bf16.mxu0 %v2881_v28  ;;  %2374 = vset.pattern.permute.xlu0 %v2881_v28  ;;  %v2378_v29 = vld [vmem:[#allocation13 + $0xc4] ss:$16 sps:$4 sm:$0xff]   ;;  %v2380_v30 = vld [vmem:[#allocation13 + $0xc0] ss:$16 sps:$4 sm:$0xff]   ;;  %v2882_v10 = vmov 1966171168  }
 0x195   : > { %801 = vmatprep.subr.bf16.mxu0 %v2375_v26  ;;  %2373 = vset.pattern.permute.xlu1 %v2881_v28  ;;  %v2381_v31 = vld [vmem:[#allocation13 + $0xa4] ss:$16 sps:$4 sm:$0xff]   ;;  %v2383_v32 = vld [vmem:[#allocation13 + $0xa0] ss:$16 sps:$4 sm:$0xff]   ;;  %v1159_v11 = vunpack.c.l.s4 %v2882_v10  ;;  %v3205_v14 = vshrl.u32 %v1161_v12, 7  ;;  %vm1221_vm2 = vcmask 58368  }
 0x196   : > { %802 = vmatpush1.bf16.msra.mxu0 %v2377_v27  ;;  %874 = vmatprep.mubr.bf16.mxu1 %v2881_v28  ;;  %v2384_v33 = vld [vmem:[#allocation13 + $0x84] ss:$16 sps:$4 sm:$0xff]   ;;  %v2386_v34 = vld [vmem:[#allocation13 + $0x80] ss:$16 sps:$4 sm:$0xff]   ;;  %v2426_v10 = vld [vmem:[#allocation13 + $0xcc] ss:$16 sps:$4 sm:$0xff]  }
 0x197   : > { %803 = vmatprep.subr.bf16.mxu0 %v2378_v29  ;;  %v2387_v35 = vld [vmem:[#allocation13 + $0x64] ss:$16 sps:$4 sm:$0xff]   ;;  %v2389_v36 = vld [vmem:[#allocation13 + $0x60] ss:$16 sps:$4 sm:$0xff]   ;;  %v1160_v13 = vunpack.c.0.s8 %v1159_v11  ;;  %v3209_v18 = vsub.s32 0, %v3205_v14  ;;  %vm1293_vm3 = vcmask 1043456  }
 0x198   : > { %v2390_v37 = vld [vmem:[#allocation13 + $0x44] ss:$16 sps:$4 sm:$0xff]   ;;  %v2392_v38 = vld [vmem:[#allocation13 + $0x40] ss:$16 sps:$4 sm:$0xff]   ;;  %v2428_v11 = vld [vmem:[#allocation13 + $0xc8] ss:$16 sps:$4 sm:$0xff]  }
 0x199   : > { %v2393_v39 = vld [vmem:[#allocation13 + $0x24] ss:$16 sps:$4 sm:$0xff]   ;;  %v2395_v40 = vld [vmem:[#allocation13 + $0x20] ss:$16 sps:$4 sm:$0xff]   ;;  %v1163_v15 = vsub.s32 %v1160_v13, %v3205_v14  ;;  %v2431_v13 = vld [vmem:[#allocation13 + $0xa8] ss:$16 sps:$4 sm:$0xff]  }
 0x19a   : > { %804 = vmatpush1.bf16.msra.mxu0 %v2380_v30  ;;  %v2396_v41 = vld [vmem:[#allocation13 + $0x4] ss:$16 sps:$4 sm:$0xff]   ;;  %v2398_v42 = vld [vmem:[#allocation13] ss:$16 sps:$4 sm:$0xff]   ;;  %vm2884_vm4 = vmmov 0   ;;  %vm1289_vm5 = vcmask 64512  }
 0x19b   : > { %805 = vmatprep.subr.bf16.mxu0 %v2381_v31  ;;  %v2401_v43 = vld [vmem:[#allocation12 + $0xe4] ss:$16 sps:$4 sm:$0xff]   ;;  %v3189_v44 = vld [vmem:[%s407_s3] sm:$0x1]  ;;  %v3193_v60 = vld [vmem:[#allocation3] sm:$0x3] }
 0x19c   : > { %v2399_v45 = vld [vmem:[#allocation12 + $0xe0] ss:$16 sps:$4 sm:$0xff]   ;;  %v2404_v46 = vld [vmem:[#allocation12 + $0xc4] ss:$16 sps:$4 sm:$0xff]   ;;  %v3197_v61 = vpack.c.bf16 %v3193_v60, %v3193_v60  ;;  %s2885_s3 = smov [#allocation19]   ;;  %p3397_p8 = scmp.eq.s32.totalorder %s2963_s19, 3 }
 0x19d   : > { %v2402_v47 = vld [vmem:[#allocation12 + $0xc0] ss:$16 sps:$4 sm:$0xff]   ;;  %v2407_v48 = vld [vmem:[#allocation12 + $0xa4] ss:$16 sps:$4 sm:$0xff]   ;;  %s1861_s4 = sshll.u32 %s2885_s3, 4  ;;  %s1862_s4 = int_to_ptr.vmem [resolvable:$true] %s1861_s4 }
 0x19e   : > { %806 = vmatpush1.bf16.msra.mxu0 %v2383_v32  ;;  %v2405_v49 = vld [vmem:[#allocation12 + $0xa0] ss:$16 sps:$4 sm:$0xff]   ;;  %v2410_v50 = vld [vmem:[#allocation12 + $0x84] ss:$16 sps:$4 sm:$0xff]   ;;  %s2757_s25 = scalar_lea.vmem %s1862_s4, 32  ;;  %p2764_p1 = scmp.lt.s32.totalorder %s1862_s4, %s1862_s4 }
 0x19f   : > { %807 = vmatprep.subr.bf16.mxu0 %v2384_v33  ;;  %v2408_v51 = vld [vmem:[#allocation12 + $0x80] ss:$16 sps:$4 sm:$0xff]   ;;  %v2413_v52 = vld [vmem:[#allocation12 + $0x64] ss:$16 sps:$4 sm:$0xff]   ;;  %p2758_p0 = scmp.ne.s32.totalorder %s1862_s4, %s2757_s25  ;;  %p2765_p12 = scmp.lt.s32.totalorder %s2757_s25, %s2757_s25 }
 0x1a0   : > { %v2411_v53 = vld [vmem:[#allocation12 + $0x60] ss:$16 sps:$4 sm:$0xff]   ;;  %v2416_v54 = vld [vmem:[#allocation12 + $0x44] ss:$16 sps:$4 sm:$0xff]  }
 0x1a1   : > { %v2414_v55 = vld [vmem:[#allocation12 + $0x40] ss:$16 sps:$4 sm:$0xff]   ;;  %v2419_v56 = vld [vmem:[#allocation12 + $0x24] ss:$16 sps:$4 sm:$0xff]   ;;  %p2759_p9 = pnand %p2758_p0, %p3397_p8  ;;  %p2766_p6 = por %p2765_p12, %p2764_p1 }
 0x1a2   : > { %808 = vmatpush1.bf16.msra.mxu0 %v2386_v34  ;;  %v2417_v57 = vld [vmem:[#allocation12 + $0x20] ss:$16 sps:$4 sm:$0xff]   ;;  %v2422_v58 = vld [vmem:[#allocation12 + $0x4] ss:$16 sps:$4 sm:$0xff]  }
 0x1a3   : > { %809 = vmatprep.subr.bf16.mxu0 %v2387_v35  ;;  %v2420_v59 = vld [vmem:[#allocation12] ss:$16 sps:$4 sm:$0xff]   ;;  %p2760_p10 = pneg %p2759_p9 }
 0x1a4   : > { %v1180_v23 = vld [vmem:[#allocation2] sm:$0xff]  ;;  %v1181_v27 = vld [vmem:[#allocation2 + $0x8] sm:$0xff] }
 0x1a5   : > { %p2767_p2 = pnand %p2766_p6, %p2760_p10 }
 0x1a6   : > { %810 = vmatpush1.bf16.msra.mxu0 %v2389_v36  ;;  %v1209_v36 = vand.u32 127, %v1161_v12  ;;  %v2429_v12 = vld [vmem:[#allocation13 + $0xac] ss:$16 sps:$4 sm:$0xff]  }
 0x1a7   : > { %811 = vmatprep.subr.bf16.mxu0 %v2390_v37 }
 0x1aa   : > { %812 = vmatpush1.bf16.msra.mxu0 %v2392_v38  ;;  %v3218_v38 = vsub.s32 %v1209_v36, %v3205_v14  ;;  %v2461_v36 = vld [vmem:[#allocation12 + $0x6c] ss:$16 sps:$4 sm:$0xff]  }
 0x1ab   : > { %813 = vmatprep.subr.bf16.mxu0 %v2393_v39 }
 0x1ae   : > { %814 = vmatpush1.bf16.msra.mxu0 %v2395_v40 }
 0x1af   : > { %815 = vmatprep.subr.bf16.mxu0 %v2396_v41 }
 0x1b2   : > { %816 = vmatpush1.bf16.msra.mxu0 %v2398_v42 }
 0x1b3   : > { %1075 = vmatprep.subr.bf16.mxu0 %v2401_v43 }
 0x1b5   : > { %834 = vmatmul.mubr.bf16.vlgmr.msra.gmra.mxu0 %v3189_v44 }
 0x1b6   : > { %1076 = vmatpush1.bf16.msra.mxu0 %v2399_v45  ;;  %1107 = vmatprep.mubr.bf16.mxu0 %v2881_v28 }
 0x1b7   : > { %1077 = vmatprep.subr.bf16.mxu0 %v2404_v46 }
 0x1ba   : > { %1078 = vmatpush1.bf16.msra.mxu0 %v2402_v47 }
 0x1bb   : > { %1079 = vmatprep.subr.bf16.mxu0 %v2407_v48 }
 0x1be   : > { %1080 = vmatpush1.bf16.msra.mxu0 %v2405_v49 }
 0x1bf   : > { %1081 = vmatprep.subr.bf16.mxu0 %v2410_v50 }
 0x1c2   : > { %1082 = vmatpush1.bf16.msra.mxu0 %v2408_v51 }
 0x1c3   : > { %1083 = vmatprep.subr.bf16.mxu0 %v2413_v52 }
 0x1c6   : > { %1084 = vmatpush1.bf16.msra.mxu0 %v2411_v53 }
 0x1c7   : > { %1085 = vmatprep.subr.bf16.mxu0 %v2416_v54 }
 0x1ca   : > { %1086 = vmatpush1.bf16.msra.mxu0 %v2414_v55 }
 0x1cb   : > { %1087 = vmatprep.subr.bf16.mxu0 %v2419_v56 }
 0x1ce   : > { %1088 = vmatpush1.bf16.msra.mxu0 %v2417_v57 }
 0x1cf   : > { %1089 = vmatprep.subr.bf16.mxu0 %v2422_v58 }
 0x1d2   : > { %1090 = vmatpush1.bf16.msra.mxu0 %v2420_v59 }
 0x1d5   : > { %1108 = vmatmul.mubr.bf16.vlgmr.msra.gmra.mxu0 %v3197_v61 }
 0x1d6   : > { %1627 = vmatprep.mubr.bf16.mxu0 %v2881_v28 }
 0x275   : > { %v3201_v62 = vpop.f32.mrf.mxu0 }
 0x277   : > { %v3203_v63 = vpop.f32.mrf.mxu0 }
 0x279   : > { %v839_v2 = vpop.f32.mrf.mxu0 }
 0x27a   : > { %v2423_v2 = vld [vmem:[#allocation13 + $0xec] ss:$16 sps:$4 sm:$0xff]  }
 0x27b   : > { %v840_v9 = vpop.f32.mrf.mxu0  ;;  %842 = vmatprep.subr.bf16.mxu1 %v2423_v2 }
 0x27c   : > { %v2425_v9 = vld [vmem:[#allocation13 + $0xe8] ss:$16 sps:$4 sm:$0xff]  }
 0x27d   : > { %843 = vmatpush1.bf16.msra.mxu1 %v2425_v9 }
 0x27e   : > { %844 = vmatprep.subr.bf16.mxu1 %v2426_v10 }
 0x281   : > { %845 = vmatpush1.bf16.msra.mxu1 %v2428_v11 }
 0x282   : > { %846 = vmatprep.subr.bf16.mxu1 %v2429_v12 }
 0x285   : > { %847 = vmatpush1.bf16.msra.mxu1 %v2431_v13 }
 0x295   : > { %v1109_v16 = vpop.f32.mrf.mxu0 }
 0x296   : > { %v1164_v17 = vrot.slane %v1109_v16, %v1163_v15  ;;  %v2434_v16 = vld [vmem:[#allocation13 + $0x88] ss:$16 sps:$4 sm:$0xff]  }
 0x297   : > { %v3211_v19 = vpop.f32.mrf.mxu0 }
 0x298   : > { %v1165_v20 = vcombine.high %v1164_v17, %v1164_v17  ;;  %v1172_v21 = vrot.slane %v1164_v17, %v1163_v15  ;;  %v2435_v17 = vld [vmem:[#allocation13 + $0x6c] ss:$16 sps:$4 sm:$0xff]  }
 0x299   : > { %v1113_v22 = vpop.f32.mrf.mxu0 }
 0x29a   : > { %v1179_v24 = vrot.slane %v1165_v20, %v1163_v15  ;;  %v1185_v25 = vrot.slane %v1172_v21, %v3209_v18  ;;  %v2432_v15 = vld [vmem:[#allocation13 + $0x8c] ss:$16 sps:$4 sm:$0xff]   ;;  %v2437_v20 = vld [vmem:[#allocation13 + $0x68] ss:$16 sps:$4 sm:$0xff]  }
 0x29b   : > { %v1114_v26 = vpop.f32.mrf.mxu0  ;;  %848 = vmatprep.subr.bf16.mxu1 %v2432_v15  ;;  %v2438_v21 = vld [vmem:[#allocation13 + $0x4c] ss:$16 sps:$4 sm:$0xff]   ;;  %v2440_v22 = vld [vmem:[#allocation13 + $0x48] ss:$16 sps:$4 sm:$0xff]  }
 0x29c   : > { %v1189_v29 = vrot.slane %v1179_v24, %v3209_v18  ;;  %v1192_v30 = vadd.f32 %v1185_v25, %v1180_v23  ;;  %849 = vmatpush1.bf16.msra.mxu1 %v2434_v16  ;;  %v2441_v23 = vld [vmem:[#allocation13 + $0x2c] ss:$16 sps:$4 sm:$0xff]   ;;  %v2443_v24 = vld [vmem:[#allocation13 + $0x28] ss:$16 sps:$4 sm:$0xff]   ;;  %v1351_v16 = vsel %vm1293_vm3, %v3142_v1, 0 }
 0x29d   : > { %850 = vmatprep.subr.bf16.mxu1 %v2435_v17  ;;  %v2444_v25 = vld [vmem:[#allocation13 + $0xc] ss:$16 sps:$4 sm:$0xff]   ;;  %v2446_v26 = vld [vmem:[#allocation13 + $0x8] ss:$16 sps:$4 sm:$0xff]  }
 0x29e   : > { %2527 = vtanh.f32 %v1192_v30  ;;  %v1193_v31 = vadd.f32 %v1189_v29, %v1181_v27  ;;  %v2449_v27 = vld [vmem:[#allocation12 + $0xec] ss:$16 sps:$4 sm:$0xff]   ;;  %v2447_v29 = vld [vmem:[#allocation12 + $0xe8] ss:$16 sps:$4 sm:$0xff]  }
 0x29f   : > { %v2452_v30 = vld [vmem:[#allocation12 + $0xcc] ss:$16 sps:$4 sm:$0xff]   ;;  %v2480_v1 = vld [vmem:[#allocation15 + $0xc8] ss:$16 sps:$4 sm:$0xff]  }
 0x2a0   : > { %2529 = vtanh.f32 %v1193_v31  ;;  %851 = vmatpush1.bf16.msra.mxu1 %v2437_v20  ;;  %v2450_v31 = vld [vmem:[#allocation12 + $0xc8] ss:$16 sps:$4 sm:$0xff]   ;;  %v2476_v17 = vld [vmem:[#allocation15 + $0xec] ss:$16 sps:$4 sm:$0xff]  }
 0x2a1   : > { %852 = vmatprep.subr.bf16.mxu1 %v2438_v21 }
 0x2a4   : > { %853 = vmatpush1.bf16.msra.mxu1 %v2440_v22  ;;  %v2474_v22 = vld [vmem:[#allocation15 + $0xe8] ss:$16 sps:$4 sm:$0xff]  }
 0x2a5   : > { %854 = vmatprep.subr.bf16.mxu1 %v2441_v23 }
 0x2a8   : > { %855 = vmatpush1.bf16.msra.mxu1 %v2443_v24 }
 0x2a9   : > { %856 = vmatprep.subr.bf16.mxu1 %v2444_v25  ;;  %v2482_v25 = vld [vmem:[#allocation15 + $0xcc] ss:$16 sps:$4 sm:$0xff]  }
 0x2ab   : > { %v2528_v32 = vpop.eup %2527 }
 0x2ac   : > { %v1200_v33 = vmul.f32 %v2528_v32, %v3150_v3  ;;  %857 = vmatpush1.bf16.msra.mxu1 %v2446_v26  ;;  %v2455_v32 = vld [vmem:[#allocation12 + $0xac] ss:$16 sps:$4 sm:$0xff]  }
 0x2ad   : > { %v2530_v34 = vpop.eup %2529  ;;  %1116 = vmatprep.subr.bf16.mxu1 %v2449_v27 }
 0x2ae   : > { %1202 = vadd.xlane.f32.xlu0 %v1200_v33  ;;  %v1201_v35 = vmul.f32 %v2530_v34, %v3150_v3  ;;  %v1232_v3 = vsub.s32 1, %v3205_v14  ;;  %v2453_v33 = vld [vmem:[#allocation12 + $0xa8] ss:$16 sps:$4 sm:$0xff]   ;;  %v2458_v34 = vld [vmem:[#allocation12 + $0x8c] ss:$16 sps:$4 sm:$0xff]  }
 0x2af   : > { %875 = vmatmul.mubr.bf16.vlgmr.msra.gmra.mxu1 %v3189_v44  ;;  %v2462_v44 = vld [vmem:[#allocation12 + $0x48] ss:$16 sps:$4 sm:$0xff]   ;;  %v2477_v14 = vld [vmem:[#allocation15 + $0xc0] ss:$16 sps:$4 sm:$0xff]  }
 0x2b0   : > { %1117 = vmatpush1.bf16.msra.mxu1 %v2447_v29  ;;  %1148 = vmatprep.mubr.bf16.mxu1 %v2881_v28  ;;  %v2488_v29 = vld [vmem:[#allocation15 + $0xac] ss:$16 sps:$4 sm:$0xff]  }
 0x2b1   : > { %1118 = vmatprep.subr.bf16.mxu1 %v2452_v30 }
 0x2b2   : > { %1204 = vadd.xlane.f32.xlu0 %v1201_v35  ;;  %v2456_v35 = vld [vmem:[#allocation12 + $0x88] ss:$16 sps:$4 sm:$0xff]  }
 0x2b4   : > { %1119 = vmatpush1.bf16.msra.mxu1 %v2450_v31  ;;  %v2486_v31 = vld [vmem:[#allocation15 + $0xa8] ss:$16 sps:$4 sm:$0xff]  }
 0x2b5   : > { %1120 = vmatprep.subr.bf16.mxu1 %v2455_v32  ;;  %v2492_v32 = vld [vmem:[#allocation15 + $0x88] ss:$16 sps:$4 sm:$0xff]  }
 0x2b8   : > { %1121 = vmatpush1.bf16.msra.mxu1 %v2453_v33  ;;  %v2497_v33 = vld [vmem:[#allocation15 + $0x64] ss:$16 sps:$4 sm:$0xff]  }
 0x2b9   : > { %1122 = vmatprep.subr.bf16.mxu1 %v2458_v34  ;;  %v2500_v34 = vld [vmem:[#allocation15 + $0x6c] ss:$16 sps:$4 sm:$0xff]  }
 0x2bc   : > { %1123 = vmatpush1.bf16.msra.mxu1 %v2456_v35  ;;  %v2495_v35 = vld [vmem:[#allocation15 + $0x60] ss:$16 sps:$4 sm:$0xff]  }
 0x2bd   : > { %1124 = vmatprep.subr.bf16.mxu1 %v2461_v36  ;;  %v2498_v36 = vld [vmem:[#allocation15 + $0x68] ss:$16 sps:$4 sm:$0xff]  }
 0x337   : > { %v1203_v37 = vpop.xlane.xlu0 %1202 }
 0x338   : > { %v1213_v40 = vrot.slane %v1203_v37, %v3218_v38 }
 0x33b   : > { %v1205_v39 = vpop.xlane.xlu0 %1204 }
 0x33c   : > { %v1217_v41 = vrot.slane %v1205_v39, %v3218_v38 }
 0x33e   : > { %v1219_v42 = vsel %vm1218_vm1, %v1217_v41, %v1213_v40  ;;  %v2467_v40 = vld [vmem:[#allocation12 + $0x2c] ss:$16 sps:$4 sm:$0xff]   ;;  %v2465_v41 = vld [vmem:[#allocation12 + $0x28] ss:$16 sps:$4 sm:$0xff]  }
 0x33f   : > { %v1222_v43 = vsel %vm1221_vm2, %v1219_v42, -inf  ;;  %v2470_v42 = vld [vmem:[#allocation12 + $0xc] ss:$16 sps:$4 sm:$0xff]  }
 0x340   : > { %1223 = vmax.xlane.f32.xlu1 %v1222_v43  ;;  %v2468_v43 = vld [vmem:[#allocation12 + $0x8] ss:$16 sps:$4 sm:$0xff]  }
 0x36f   : > { %v3252_v2 = vpop.f32.mrf.mxu1 }
 0x371   : > { %v3254_v9 = vpop.f32.mrf.mxu1 }
 0x373   : > { %v880_v10 = vpop.f32.mrf.mxu1 }
 0x374   : > { %v2519_v10 = vld [vmem:[#allocation16 + $0x38] sm:$0xff]  }
 0x375   : > { %v881_v11 = vpop.f32.mrf.mxu1 }
 0x376   : > { %v2520_v11 = vld [vmem:[#allocation16 + $0x30] sm:$0xff]  }
 0x3c9   : > { %v1224_v45 = vpop.xlane.xlu1 %1223 }
 0x3ca   : > { %v1229_v46 = vrot.slane %v1224_v45, %v3209_v18  ;;  %v1233_v47 = vrot.slane %v1224_v45, %v1232_v3  ;;  %v2883_v45 = vmov 0.0  }
 0x3cc   : > { %v1236_v48 = vsub.f32 %v1203_v37, %v1229_v46  ;;  %v1237_v49 = vsub.f32 %v1205_v39, %v1233_v47  ;;  %v2459_v37 = vld [vmem:[#allocation12 + $0x68] ss:$16 sps:$4 sm:$0xff]   ;;  %v2464_v39 = vld [vmem:[#allocation12 + $0x4c] ss:$16 sps:$4 sm:$0xff]   ;;  %v1295_v46 = vsel %vm1293_vm3, %v3140_v0, 0 }
 0x3cd   : > { %1125 = vmatpush1.bf16.msra.mxu1 %v2459_v37  ;;  %v2506_v37 = vld [vmem:[#allocation15 + $0x4c] ss:$16 sps:$4 sm:$0xff]  }
 0x3ce   : > { %v1238_v50 = vmul.f32 1.442695, %v1236_v48  ;;  %v1240_v51 = vmul.f32 1.442695, %v1237_v49  ;;  %1126 = vmatprep.subr.bf16.mxu1 %v2464_v39  ;;  %v2501_v39 = vld [vmem:[#allocation15 + $0x40] ss:$16 sps:$4 sm:$0xff]  }
 0x3d0   : > { %2531 = vpow2.f32 %v1238_v50 }
 0x3d1   : > { %2533 = vpow2.f32 %v1240_v51  ;;  %1127 = vmatpush1.bf16.msra.mxu1 %v2462_v44  ;;  %v2504_v44 = vld [vmem:[#allocation15 + $0x48] ss:$16 sps:$4 sm:$0xff]  }
 0x3d2   : > { %1128 = vmatprep.subr.bf16.mxu1 %v2467_v40  ;;  %v2509_v40 = vld [vmem:[#allocation15 + $0x24] ss:$16 sps:$4 sm:$0xff]  }
 0x3d5   : > { %1129 = vmatpush1.bf16.msra.mxu1 %v2465_v41  ;;  %v2512_v41 = vld [vmem:[#allocation15 + $0x2c] ss:$16 sps:$4 sm:$0xff]  }
 0x3d6   : > { %1130 = vmatprep.subr.bf16.mxu1 %v2470_v42  ;;  %v2507_v42 = vld [vmem:[#allocation15 + $0x20] ss:$16 sps:$4 sm:$0xff]  }
 0x3d9   : > { %1131 = vmatpush1.bf16.msra.mxu1 %v2468_v43  ;;  %v2510_v43 = vld [vmem:[#allocation15 + $0x28] ss:$16 sps:$4 sm:$0xff]  }
 0x3da   : > { %2199 = vmatprep.subr.bf16.mxu1 %v2883_v45 }
 0x3dc   : > { %1149 = vmatmul.mubr.bf16.vlgmr.msra.gmra.mxu1 %v3197_v61 }
 0x3dd   : > { %v3228_v52 = vpop.eup %2531  ;;  %2200 = vmatpush3.bf16.msra.mxu1 %v1295_v46  ;;  %2201 = vmatprep.mubr.msk.bf16.mxu1 %vm2884_vm4, %v2883_v45  ;;  %v2515_v46 = vld [vmem:[#allocation15 + $0x4] ss:$16 sps:$4 sm:$0xff]  }
 0x3de   : > { %v3230_v53 = vpop.eup %2533  ;;  %1245 = vperm.xlu1 %2373, %v3228_v52   ;;  %2205 = vmatprep.subr.bf16.mxu1 %v2883_v45 }
 0x3df   : > { %1248 = vperm.xlu0 %2374, %v3230_v53  }
 0x459   : > { %v1246_v54 = vpop.permute.xlu1 %1245 }
 0x45a   : > { %v1249_v55 = vpop.permute.xlu0 %1248  ;;  %v1253_v56 = vrot.slane %v1246_v54, %v3218_v38 }
 0x45b   : > { %v1257_v57 = vrot.slane %v1249_v55, %v3218_v38 }
 0x45d   : > { %v1258_v58 = vsel %vm1218_vm1, %v1257_v57, %v1253_v56  ;;  %v2471_v57 = vld [vmem:[#allocation15 + $0xe0] ss:$16 sps:$4 sm:$0xff]  }
 0x45e   : > { %v1260_v59 = vsel %vm1221_vm2, %v1258_v58, 0.0  ;;  %v2473_v58 = vld [vmem:[#allocation15 + $0xe4] ss:$16 sps:$4 sm:$0xff]  }
 0x45f   : > { %1261 = vadd.xlane.f32.xlu1 %v1260_v59  ;;  %1595 = vmatprep.subr.bf16.mxu0 %v2473_v58  ;;  %v2489_v59 = vld [vmem:[#allocation15 + $0x80] ss:$16 sps:$4 sm:$0xff]  }
 0x460   : > { %1596 = vmatpush1.bf16.msra.mxu0 %v2471_v57 }
 0x49c   : > { %v3262_v24 = vpop.f32.mrf.mxu1 }
 0x49e   : > { %v3264_v26 = vpop.f32.mrf.mxu1 }
 0x4a0   : > { %v1154_v27 = vpop.f32.mrf.mxu1 }
 0x4a2   : > { %v1155_v30 = vpop.f32.mrf.mxu1 }
 0x4e8   : > { %v1262_v47 = vpop.xlane.xlu1 %1261 }
 0x4e9   : > { %2535 = vrcp.f32 %v1262_v47  ;;  %v2518_v47 = vld [vmem:[#allocation15 + $0xc] ss:$16 sps:$4 sm:$0xff]  }
 0x4f6   : > { %v2536_v48 = vpop.eup %2535 }
 0x4f7   : > { %v1268_v49 = vrot.slane %v2536_v48, %v3209_v18  ;;  %v1272_v50 = vrot.slane %v2536_v48, %v1232_v3  ;;  %v2479_v18 = vld [vmem:[#allocation15 + $0xc4] ss:$16 sps:$4 sm:$0xff]   ;;  %v2513_v48 = vld [vmem:[#allocation15] ss:$16 sps:$4 sm:$0xff]  }
 0x4f8   : > { %1597 = vmatprep.subr.bf16.mxu0 %v2479_v18  ;;  %v2485_v3 = vld [vmem:[#allocation15 + $0xa4] ss:$16 sps:$4 sm:$0xff]  }
 0x4f9   : > { %v1275_v51 = vmul.f32 %v3228_v52, %v1268_v49  ;;  %v1276_v54 = vmul.f32 %v3230_v53, %v1272_v50  ;;  %1598 = vmatpush1.bf16.msra.mxu0 %v2477_v14  ;;  %v2483_v52 = vld [vmem:[#allocation15 + $0xa0] ss:$16 sps:$4 sm:$0xff]   ;;  %v2491_v53 = vld [vmem:[#allocation15 + $0x84] ss:$16 sps:$4 sm:$0xff]   ;;  %v2516_v49 = vld [vmem:[#allocation15 + $0x8] ss:$16 sps:$4 sm:$0xff]  }
 0x4fa   : > { %1599 = vmatprep.subr.bf16.mxu0 %v2485_v3 }
 0x4fb   : > { %v1277_v55 = vpack.c.bf16 %v1275_v51, %v1275_v51  ;;  %v1278_v0 = vpack.c.bf16 %v1276_v54, %v1276_v54 }
 0x4fd   : > { %v1280_v56 = vunpack.c.l.b16 %v1277_v55  ;;  %v1338_v61 = vunpack.c.l.b16 %v1278_v0  ;;  %1600 = vmatpush1.bf16.msra.mxu0 %v2483_v52 }
 0x4fe   : > { %1601 = vmatprep.subr.bf16.mxu0 %v2491_v53 }
 0x4ff   : > { %1282 = vperm.xlu0 %2374, %v1280_v56  }
 0x501   : > { %1602 = vmatpush1.bf16.msra.mxu0 %v2489_v59 }
 0x502   : > { %1603 = vmatprep.subr.bf16.mxu0 %v2497_v33 }
 0x503   : > { %1340 = vperm.xlu0 %2374, %v1338_v61  }
 0x505   : > { %1604 = vmatpush1.bf16.msra.mxu0 %v2495_v35 }
 0x57a   : > { %v1283_v12 = vpop.permute.xlu0 %1282 }
 0x57b   : > { %v1287_v13 = vrot.slane %v1283_v12, %v3218_v38  ;;  %v2521_v12 = vld [vmem:[#allocation16 + $0x28] sm:$0xff]  }
 0x57d   : > { %v1288_v15 = vpack.c.b16 %v1287_v13, %v1287_v13  ;;  %v2522_v13 = vld [vmem:[#allocation16 + $0x20] sm:$0xff]  }
 0x57e   : > { %v1341_v20 = vpop.permute.xlu0 %1340 }
 0x57f   : > { %2202 = vmatmul.mubr.msk.bf16.vlgmr.msra.gmra.mxu1 %vm1289_vm5, %v1288_v15  ;;  %v1345_v21 = vrot.slane %v1341_v20, %v3218_v38  ;;  %v2494_v38 = vld [vmem:[#allocation15 + $0x8c] ss:$16 sps:$4 sm:$0xff]   ;;  %v2526_v20 = vld [vmem:[#allocation16] sm:$0xff]  }
 0x580   : > { %2206 = vmatpush3.bf16.msra.mxu1 %v1351_v16  ;;  %2207 = vmatprep.mubr.msk.bf16.mxu1 %vm2884_vm4, %v2883_v45  ;;  %v2523_v15 = vld [vmem:[#allocation16 + $0x18] sm:$0xff]   ;;  %v2524_v16 = vld [vmem:[#allocation16 + $0x10] sm:$0xff]  }
 0x581   : > { %1636 = vmatprep.subr.bf16.mxu1 %v2476_v17  ;;  %v1346_v23 = vpack.c.b16 %v1345_v21, %v1345_v21  ;;  %v2525_v17 = vld [vmem:[#allocation16 + $0x8] sm:$0xff]  }
 0x587   : > { %2208 = vmatmul.mubr.msk.bf16.vlgmr.msra.gmra.mxu1 %vm1289_vm5, %v1346_v23 }
 0x588   : > { %1637 = vmatpush1.bf16.msra.mxu1 %v2474_v22  ;;  %1668 = vmatprep.mubr.bf16.mxu1 %v2881_v28  ;;  %v2503_v28 = vld [vmem:[#allocation15 + $0x44] ss:$16 sps:$4 sm:$0xff]  }
 0x589   : > { %1638 = vmatprep.subr.bf16.mxu1 %v2482_v25  ;;  %1605 = vmatprep.subr.bf16.mxu0 %v2503_v28 }
 0x58a   : > { %1606 = vmatpush1.bf16.msra.mxu0 %v2501_v39 }
 0x58b   : > { %1607 = vmatprep.subr.bf16.mxu0 %v2509_v40 }
 0x58c   : > { %1639 = vmatpush1.bf16.msra.mxu1 %v2480_v1 }
 0x58d   : > { %1640 = vmatprep.subr.bf16.mxu1 %v2488_v29 }
 0x58e   : > { %1608 = vmatpush1.bf16.msra.mxu0 %v2507_v42 }
 0x58f   : > { %1609 = vmatprep.subr.bf16.mxu0 %v2515_v46 }
 0x590   : > { %1641 = vmatpush1.bf16.msra.mxu1 %v2486_v31 }
 0x591   : > { %1642 = vmatprep.subr.bf16.mxu1 %v2494_v38 }
 0x592   : > { %1610 = vmatpush1.bf16.msra.mxu0 %v2513_v48 }
 0x593   : > { %2211 = vmatprep.subr.bf16.mxu0 %v2883_v45 }
 0x594   : > { %1643 = vmatpush1.bf16.msra.mxu1 %v2492_v32 }
 0x595   : > { %1644 = vmatprep.subr.bf16.mxu1 %v2500_v34 }
 0x598   : > { %1645 = vmatpush1.bf16.msra.mxu1 %v2498_v36 }
 0x599   : > { %1646 = vmatprep.subr.bf16.mxu1 %v2506_v37 }
 0x59c   : > { %1647 = vmatpush1.bf16.msra.mxu1 %v2504_v44 }
 0x59d   : > { %1648 = vmatprep.subr.bf16.mxu1 %v2512_v41 }
 0x5a0   : > { %1649 = vmatpush1.bf16.msra.mxu1 %v2510_v43 }
 0x5a1   : > { %1650 = vmatprep.subr.bf16.mxu1 %v2518_v47 }
 0x5a4   : > { %1651 = vmatpush1.bf16.msra.mxu1 %v2516_v49 }
 0x63f   : > { %v1331_v50 = vpop.f32.mrf.mxu1 }
 0x640   : > { %v1393_v0 = vpack.c.bf16 %v1331_v50, %v1331_v50 }
 0x641   : > { %v2203_v51 = vpop.f32.mrf.mxu1 }
 0x642   : > { %v1429_v14 = vunpack.c.l.b16 %v1393_v0 }
 0x643   : > { %v1334_v54 = vpop.f32.mrf.mxu1 }
 0x645   : > { %v2204_v55 = vpop.f32.mrf.mxu1 }
 0x647   : > { %v1387_v56 = vpop.f32.mrf.mxu1 }
 0x648   : > { %v1394_v61 = vpack.c.bf16 %v1387_v56, %v1387_v56 }
 0x649   : > { %v2209_v57 = vpop.f32.mrf.mxu1 }
 0x64a   : > { %v1430_v58 = vunpack.c.l.b16 %v1394_v61 }
 0x64b   : > { %v1390_v18 = vpop.f32.mrf.mxu1 }
 0x64c   : > { %v1431_v3 = vrot.slane %v1430_v58, 7 }
 0x64d   : > { %v2210_v52 = vpop.f32.mrf.mxu1 }
 0x64e   : > { %v1432_v53 = vsel %vm1218_vm1, %v1431_v3, %v1429_v14 }
 0x64f   : > { %v1433_v59 = vpack.c.b16 %v1432_v53, %v1432_v53 }
 0x651   : > { %1628 = vmatmul.mubr.bf16.vlgmr.msra.gmra.mxu0 %v1433_v59  ;;  %1669 = vmatmul.mubr.bf16.vlgmr.msra.gmra.mxu1 %v1433_v59 }
 0x652   : > { %2227 = vmatprep.mubr.msk.bf16.mxu0 %vm2884_vm4, %v2883_v45  ;;  %2212 = vmatpush3.bf16.msra.mxu0 %v2519_v10 }
 0x653   : > { %2213 = vmatprep.subr.bf16.mxu0 %v2883_v45 }
 0x656   : > { %2214 = vmatpush3.bf16.msra.mxu0 %v2520_v11 }
 0x657   : > { %2215 = vmatprep.subr.bf16.mxu0 %v2883_v45 }
 0x65a   : > { %2216 = vmatpush3.bf16.msra.mxu0 %v2521_v12 }
 0x65b   : > { %2217 = vmatprep.subr.bf16.mxu0 %v2883_v45 }
 0x65e   : > { %2218 = vmatpush3.bf16.msra.mxu0 %v2522_v13 }
 0x65f   : > { %2219 = vmatprep.subr.bf16.mxu0 %v2883_v45 }
 0x662   : > { %2220 = vmatpush3.bf16.msra.mxu0 %v2523_v15 }
 0x663   : > { %2221 = vmatprep.subr.bf16.mxu0 %v2883_v45 }
 0x666   : > { %2222 = vmatpush3.bf16.msra.mxu0 %v2524_v16 }
 0x667   : > { %2223 = vmatprep.subr.bf16.mxu0 %v2883_v45 }
 0x66a   : > { %2224 = vmatpush3.bf16.msra.mxu0 %v2525_v17 }
 0x66b   : > { %2225 = vmatprep.subr.bf16.mxu0 %v2883_v45 }
 0x66e   : > { %2226 = vmatpush3.bf16.msra.mxu0 %v2526_v20 }
 0x711   : > { %v1629_v21 = vpop.f32.mrf.mxu0  ;;  %v1670_v22 = vpop.f32.mrf.mxu1 }
 0x712   : > { %v1677_v23 = vadd.f32 %v1629_v21, %v3201_v62 }
 0x713   : > { %v1631_v25 = vpop.f32.mrf.mxu0  ;;  %v1672_v1 = vpop.f32.mrf.mxu1 }
 0x714   : > { %v1681_v27 = vadd.f32 %v1677_v23, %v3211_v19  ;;  %v1678_v29 = vadd.f32 %v1631_v25, %v3203_v63  ;;  %v1679_v63 = vadd.f32 %v1670_v22, %v3252_v2 }
 0x715   : > { %v1633_v30 = vpop.f32.mrf.mxu0  ;;  %v1674_v31 = vpop.f32.mrf.mxu1 }
 0x716   : > { %v1686_v38 = vadd.f32 %v3155_v4, %v1681_v27  ;;  %v1693_v45 = vadd.f32 %v1678_v29, %v3262_v24  ;;  %v1714_v4 = vadd.f32 %v3170_v7, %v3264_v26  ;;  %v1709_v44 = vadd.f32 %v3165_v6, %v1679_v63 }
 0x717   : > { %v1634_v32 = vpop.f32.mrf.mxu0  ;;  %v1675_v33 = vpop.f32.mrf.mxu1 }
 0x718   : > { %v2137_v34 = vmul.f32 -1.442695, %v1686_v38  ;;  %v1698_v35 = vadd.f32 %v3160_v5, %v1693_v45 }
 0x71a   : > { %2537 = vpow2.f32 %v2137_v34  ;;  %v2139_v36 = vmul.f32 -1.442695, %v1698_v35 }
 0x71c   : > { %2539 = vpow2.f32 %v2139_v36 }
 0x727   : > { %v2538_v62 = vpop.eup %2537 }
 0x728   : > { %v1690_v28 = vadd.f32 1.0, %v2538_v62 }
 0x729   : > { %v2540_v19 = vpop.eup %2539 }
 0x72a   : > { %2541 = vrcp.f32 %v1690_v28  ;;  %v1702_v37 = vadd.f32 1.0, %v2540_v19 }
 0x72c   : > { %2543 = vrcp.f32 %v1702_v37 }
 0x737   : > { %v2542_v39 = vpop.eup %2541 }
 0x738   : > { %v1715_v40 = vmul.f32 %v2542_v39, %v1714_v4 }
 0x739   : > { %v2544_v5 = vpop.eup %2543 }
 0x73a   : > { %v1716_v24 = vadd.f32 %v1715_v40, %v1709_v44  ;;  %v1718_v41 = vsub.f32 1.0, %v2544_v5  ;;  %v1720_v46 = vmul.f32 %v2544_v5, %v3193_v60 }
 0x73c   : > { %2545 = vtanh.f32 %v1716_v24 }
 0x749   : > { %v2546_v42 = vpop.eup %2545 }
 0x74a   : > { %v1719_v43 = vmul.f32 %v2546_v42, %v1718_v41 }
 0x74c   : > { %v1721_v47 = vadd.f32 %v1720_v46, %v1719_v43 }
 0x74e   : > { %1722 = vst [vmem:[#allocation3] sm:$0x3] %v1721_v47  ;;  %v1729_v2 = vpack.c.bf16 %v1721_v47, %v1721_v47  ;;  %1723 = vst [vmem:[#allocation19] sm:$0x3] %v1721_v47 }
 0x750   : > { %2228 = vmatmul.mubr.bf16.vlgmr.msra.gmra.mxu0 %v1729_v2 }
 0x751   : > { %2770 = shalt.err (!%p2767_p2)
}
 0x752   : > { %p3398_p5 = pmov %p3397_p8  ;;  %v1680_v6 = vadd.f32 %v1672_v1, %v3254_v9  ;;  %s2152_s23 = sshll.u32 %s2963_s19, 5 }
 0x753   : > { %s1850_s27 = sshll.u32 %s3177_s20, 4  ;;  %s3303_s11 = scalar_lea.hbm %s3359_s9, %s2152_s23  ;;  %s3305_s27 = int_to_ptr.vmem [resolvable:$true] %s1850_s27 }
 0x754   : > { %2263 = dma.vmem_to_hbm [thread:$0]  (%p3398_p5), %s1862_s4, 32, %s3360_s10, [#allocation20]   ;;  %v1728_v7 = vadd.f32 %v3175_v8, %v1680_v6 }
 0x755   : > { %s1837_s30 = scalar_lea.sflag [#allocation6], %s3115_s1  ;;  %s2781_s22 = scalar_lea.vmem %s3305_s27, 32 }
 0x756   : > { %p2782_p7 = scmp.ne.s32.totalorder %s3305_s27, %s2781_s22  ;;  %p3399_p11 = scmp.ne.s32.totalorder %s3383_s12, 0 }
 0x757   : > { %s2886_s2 = smov [#allocation18]  }
 0x758   : > { %p2783_p3 = pnand %p2782_p7, %p3399_p11  ;;  %s2785_s5 = sshll.u32 %s2886_s2, 4  ;;  %s2786_s5 = int_to_ptr.vmem [resolvable:$false] %s2785_s5 }
 0x759   : > { %s2787_s3 = scalar_lea.vmem %s2786_s5, 64  ;;  %p2788_p13 = scmp.lt.s32.totalorder %s3305_s27, %s2786_s5 }
 0x75a   : > { %p2784_p4 = pneg %p2783_p3  ;;  %p2789_p0 = scmp.lt.s32.totalorder %s2787_s3, %s2781_s22 }
 0x75c   : > { %p2790_p8 = por %p2789_p0, %p2788_p13 }
 0x75e   : > { %p2791_p9 = pnand %p2790_p8, %p2784_p4 }
 0x810   : > { %v1828_v60 = vpop.f32.mrf.mxu0 }
 0x811   : > { %v1834_v26 = vadd.f32 %v1828_v60, %v1728_v7 }
 0x812   : > { %v2229_v48 = vpop.f32.mrf.mxu0 }
 0x813   : > { %1835 = vst [vmem:[%s3177_s20] sm:$0x3] %v1834_v26 }
 0x814   : > { %v1831_v49 = vpop.f32.mrf.mxu0 }
 0x815   : > { %2794 = shalt.err (!%p2791_p9)
}
 0x816   : > { %s2795_s20 = scalar_lea.hbm %s3303_s11, 32  ;;  %s2799_s25 = scalar_lea.hbm %s3359_s9, 128 }
 0x817   : > { %p2796_p10 = scmp.ne.s32.totalorder %s3303_s11, %s2795_s20  ;;  %p2800_p6 = scmp.lt.s32.totalorder %s3303_s11, %s3359_s9 }
 0x818   : > { %p2801_p2 = scmp.lt.s32.totalorder %s2799_s25, %s2795_s20 }
 0x819   : > { %p2797_p1 = pnand %p2796_p10, %p3399_p11 }
 0x81a   : > { %p2802_p5 = por %p2801_p2, %p2800_p6 }
 0x81b   : > { %p2798_p12 = pneg %p2797_p1 }
 0x81d   : > { %p2803_p7 = pnand %p2802_p5, %p2798_p12 }
 0x81f   : > { %2806 = shalt.err (!%p2803_p7)
}
 0x820   : > { %2261 = dma.vmem_to_hbm [thread:$0]  (%p3399_p11), %s3305_s27, 32, %s3303_s11, %s1837_s30   ;;  %v2230_v8 = vpop.f32.mrf.mxu0 }
 0x821   : > { %p3400_p3 = scmp.eq.s32.totalorder %s2963_s19, 3 }
 0x823   : > { %2844 = dma.done.wait (%p3400_p3), [#allocation20], 32   ;;  %p3401_p4 = pmov %p3400_p3 }
 0x825   : > { %2846 = vsyncadd (%p3401_p4), [#allocation20], 4294967264 }
 0x826 PF: > { %p2314_p13 = scmp.ge.s32.totalorder %s2865_s16, 2  ;;  %s1877_s23 = sand.u32 1, %s2853_s13  }
 0x827   : > { %p3402_p0 = scmp.ne.s32.totalorder %s3384_s18, 0  ;;  %s1878_s12 = scalar_lea.sflag [#allocation6], %s1877_s23 }
 0x829   : > { %p2294_p8 = pnand %p2314_p13, %p3402_p0 }
 0x82b   : > { %p2295_p9 = pneg %p2294_p8 }
 0x82d   : > { %2848 = dma.done.wait (%p2295_p9), %s1878_s12, 32  }
 0x82e   : > { %2850 = vsyncadd (%p2295_p9), %s1878_s12, 4294967264  ;;  %p29_p11 = scmp.ge.s32.totalorder %s3056_s26, 6   ;;  %s3403_s13 = smov %s2857_s14 }
 0x82f   : > { %s3404_s14 = smov %s2861_s15  ;;  %s3405_s15 = smov %s3068_s21 }
 0x830   : > { %s3406_s16 = smov %s3056_s26  ;;  %31 = sbr.rel (!%p29_p11) target bundleno = 16 (0x10), region = 141 }
 0x835   :  { %1883 = vsyncpa [#allocation5], 1 }
 0x836   :  { %1885 = vsyncpa [#allocation5 + $0x1], 1 }
 0x837   :  { %1886 = vsyncpa [#allocation8], 1 }
 0x838   :  { %1887 = vsyncpa [#allocation11], 1 }
 0x839   :  { %1888 = vsyncpa [#allocation14], 1 }
 0x83a   :  { %1889 = vsyncpa [#allocation17], 1 }
 0x83b   :  { %1890 = vsyncpa [#allocation6], 1 }
 0x83c   :  { %1892 = vsyncpa [#allocation6 + $0x1], 1 }
 0x83d   :  { %1893 = vsyncpa [#allocation20], 1 }

</bundles_post_ra>
